<compile_context>
chip_gen: v7x
topology: tpu7x:2x2x1
jax: 0.10.0
libtpu: 0.0.40
codegen_flags: <defaults>
</compile_context>

<pallas_src>
import functools

import jax
import jax.numpy as jnp
from jax import lax
from jax.experimental import pallas as pl
from jax.experimental.pallas import tpu as pltpu

EPS = 1e-5
MXU_DTYPE = jnp.bfloat16   # bf16 MXU inputs, f32 accumulation


def fused_conv_bn_relu_conv_kernel(x_ref, w1_ref, bn_ref, w2_ref, o_ref,
                                   acc_ref, ypad_ref, *, H, W, Cout, eps):
    """x_ref:(Kblk,H*W) f32   w1_ref:(Cmid,Kblk) bf16   bn_ref:(Cmid,2) f32
       w2_ref:(9*Cout,Cmid) bf16   o_ref:(Cout,H*(W+2)) f32
       acc_ref: VMEM (Cmid,H*W) f32   ypad_ref: VMEM (Cmid,(H+2)*(W+2)) bf16."""
    k = pl.program_id(0)
    Wp = W + 2

    # ---- Stage 1 (per K block): 1x1 conv as a channel-major partial matmul.
    @pl.when(k == 0)
    def _():
        acc_ref[...] = jnp.zeros_like(acc_ref)

    xb = x_ref[...].astype(MXU_DTYPE)                                 # (Kblk, H*W)
    acc_ref[...] += jnp.dot(w1_ref[...], xb,
                            preferred_element_type=jnp.float32)       # (Cmid, H*W) f32

    # ---- Last K block: BN(batch stats, folded affine) + ReLU + 3x3 conv + store.
    @pl.when(k == pl.num_programs(0) - 1)
    def _():
        y = acc_ref[...]                                              # (Cmid, H*W) f32
        mean = jnp.mean(y, axis=1, keepdims=True)                     # per-channel stats
        var = jnp.mean(jnp.square(y - mean), axis=1, keepdims=True)   # biased var (train)
        scale = bn_ref[:, 0:1] * lax.rsqrt(var + eps)                 # gamma * rsqrt
        shift = bn_ref[:, 1:2] - mean * scale                         # beta - mean*scale
        y = jnp.maximum(y * scale + shift, 0.0).astype(ypad_ref.dtype)

        # Zero-padded activation plane in VMEM (channel-major, flat spatial).
        ypad_ref[...] = jnp.zeros_like(ypad_ref)
        for h in range(H):
            base = (h + 1) * Wp + 1
            ypad_ref[:, base:base + W] = y[:, h * W:(h + 1) * W]

        # Stage 2: one lane-dense MXU call over all 9 taps' stacked weights ...
        z = jnp.dot(w2_ref[...], ypad_ref[...],
                    preferred_element_type=jnp.float32)               # (9*Cout,(H+2)*Wp)

        # ... then shifted-window accumulation on the VPU.
        span = (H - 1) * Wp + W                    # covers every flat index r = h*Wp + w
        acc2 = z[0:Cout, 0:span]
        for idx in range(1, 9):
            kh, kw = idx // 3, idx % 3
            sh = kh * Wp + kw
            acc2 = acc2 + z[idx * Cout:(idx + 1) * Cout, sh:sh + span]

        # Single dense store at lane offset 0; output keeps padded-row stride Wp.
        # (Columns w in {W, W+1} of each row hold cross-row garbage / zeros; the
        #  wrapper slices them off before any consumer sees them.)
        o_ref[:, :span] = acc2
        o_ref[:, span:] = jnp.zeros((Cout, H * Wp - span), o_ref.dtype)


def prepare_params(w1, gamma, beta, w2):
    """One-time parameter prep (outside the per-call path): bf16 weights, packed BN."""
    Cmid, Cin = w1.shape[0], w1.shape[1]
    Cout = w2.shape[0]
    w1_mat = w1.reshape(Cmid, Cin).astype(MXU_DTYPE)                  # (Cmid, Cin) bf16
    bn = jnp.stack([gamma.astype(jnp.float32),
                    beta.astype(jnp.float32)], axis=1)                # (Cmid, 2) f32
    # 3x3 weights stacked tap-major: row (kh*3+kw)*Cout + o, column c.
    w2_taps = jnp.transpose(w2, (2, 3, 0, 1)).reshape(9 * Cout, Cmid).astype(MXU_DTYPE)
    return w1_mat, bn, w2_taps


def forward(x_nchw, w1_mat, bn, w2_taps, *, k_blocks=2):
    """x_nchw: (1, Cin, H, W) f32; w1_mat: (Cmid, Cin) bf16; bn: (Cmid, 2) f32;
       w2_taps: (9*Cout, Cmid) bf16."""
    N, Cin, H, W = x_nchw.shape
    Cmid = w1_mat.shape[0]
    Cout = w2_taps.shape[0] // 9
    Wp = W + 2
    assert N == 1, "kernel is specialized for batch size 1"
    assert Cin % k_blocks == 0
    kblk = Cin // k_blocks

    # Free reshape: NCHW is already channel-major.
    x_cs = x_nchw.reshape(Cin, H * W)

    flops = 2 * (Cmid * Cin * H * W + (9 * Cout) * Cmid * (H + 2) * Wp)
    bytes_accessed = (x_cs.size * 4 + w1_mat.size * 2 + w2_taps.size * 2
                      + bn.size * 4 + Cout * H * Wp * 4)

    kernel = functools.partial(fused_conv_bn_relu_conv_kernel,
                               H=H, W=W, Cout=Cout, eps=EPS)
    out = pl.pallas_call(
        kernel,
        out_shape=jax.ShapeDtypeStruct((Cout, H * Wp), jnp.float32),
        grid=(k_blocks,),
        in_specs=[
            pl.BlockSpec((kblk, H * W), lambda k: (k, 0)),        # x: K-blocked rows
            pl.BlockSpec((Cmid, kblk), lambda k: (0, k)),         # w1: K-blocked cols
            pl.BlockSpec((Cmid, 2), lambda k: (0, 0)),            # packed gamma/beta
            pl.BlockSpec((9 * Cout, Cmid), lambda k: (0, 0)),     # stacked 3x3 weights
        ],
        out_specs=pl.BlockSpec((Cout, H * Wp), lambda k: (0, 0)),
        scratch_shapes=[
            pltpu.VMEM((Cmid, H * W), jnp.float32),               # stage-1 f32 accumulator
            pltpu.VMEM((Cmid, (H + 2) * Wp), MXU_DTYPE),          # padded activation plane
        ],
        compiler_params=pltpu.CompilerParams(dimension_semantics=("arbitrary",)),
        cost_estimate=pl.CostEstimate(flops=flops, transcendentals=0,
                                      bytes_accessed=bytes_accessed),
    )(x_cs, w1_mat, bn, w2_taps)

    # Drop the 2 pad columns per row; result is NCHW-ordered already.
    return out.reshape(Cout, H, Wp)[:, :, :W].reshape(N, Cout, H, W)


def reference_forward(x, w1, gamma, beta, w2):
    """Pure-JAX (f32) reference matching torch train-mode forward."""
    dn = ("NCHW", "OIHW", "NCHW")
    y = lax.conv_general_dilated(x, w1, (1, 1), "VALID", dimension_numbers=dn)
    mean = jnp.mean(y, axis=(0, 2, 3), keepdims=True)
    var = jnp.mean(jnp.square(y - mean), axis=(0, 2, 3), keepdims=True)
    y = (y - mean) * lax.rsqrt(var + EPS)
    y = y * gamma.reshape(1, -1, 1, 1) + beta.reshape(1, -1, 1, 1)
    y = jnp.maximum(y, 0.0)
    return lax.conv_general_dilated(y, w2, (1, 1), ((1, 1), (1, 1)),
                                    dimension_numbers=dn)


if __name__ == "__main__":
    key = jax.random.PRNGKey(0)
    kx, k1, k2 = jax.random.split(key, 3)

    N, Cin, H, W = 1, 1536, 7, 7
    Cmid, Cout = 128, 32

    x = jax.random.normal(kx, (N, Cin, H, W), dtype=jnp.float32)
    w1 = jax.random.normal(k1, (Cmid, Cin, 1, 1), dtype=jnp.float32) * 0.02
    gamma = jnp.ones((Cmid,), dtype=jnp.float32)   # BatchNorm2d affine weight
    beta = jnp.zeros((Cmid,), dtype=jnp.float32)   # BatchNorm2d affine bias
    w2 = jax.random.normal(k2, (Cout, Cmid, 3, 3), dtype=jnp.float32) * 0.02

    # One-time weight prep (bf16 cast, tap stacking, BN packing) outside the call path.
    w1_mat, bn, w2_taps = prepare_params(w1, gamma, beta, w2)
    jax.block_until_ready((w1_mat, bn, w2_taps))

    out = jax.jit(forward)(x, w1_mat, bn, w2_taps)
    jax.block_until_ready(out)
    assert out.shape == (N, Cout, H, W), out.shape

    # Loose sanity check vs the f32 reference (kernel uses bf16 MXU inputs / f32 accum).
    ref = jax.jit(reference_forward)(x, w1, gamma, beta, w2)
    max_err = float(jnp.max(jnp.abs(out - ref)))
    assert max_err < 2e-1, f"max abs error too large: {max_err}"

    print("KERNEL_OK")
</pallas_src>

<mosaic_0001>
module attributes {stable_mosaic.version = 11 : i64} {
  func.func @fused_conv_bn_relu_conv_kernel(%arg0: i32, %arg1: memref<768x49xf32, #tpu.memory_space<vmem>>, %arg2: memref<128x768xbf16, #tpu.memory_space<vmem>>, %arg3: memref<128x2xf32, #tpu.memory_space<vmem>>, %arg4: memref<288x128xbf16, #tpu.memory_space<vmem>>, %arg5: memref<32x63xf32, #tpu.memory_space<vmem>>, %arg6: memref<128x49xf32, #tpu.memory_space<vmem>>, %arg7: memref<128x81xbf16, #tpu.memory_space<vmem>>) attributes {dimension_semantics = [#tpu.dimension_semantics<arbitrary>], iteration_bounds = array<i64: 2>, scalar_prefetch = 0 : i64, scratch_operands = 2 : i64, tpu.core_type = #tpu.core_type<tc>, window_params = [{transform_indices = @transform_0, window_bounds = array<i64: 768, 49>}, {transform_indices = @transform_1, window_bounds = array<i64: 128, 768>}, {pipeline_mode = #tpu.pipeline_mode<synchronous>, transform_indices = @transform_2, window_bounds = array<i64: 128, 2>}, {pipeline_mode = #tpu.pipeline_mode<synchronous>, transform_indices = @transform_3, window_bounds = array<i64: 288, 128>}, {pipeline_mode = #tpu.pipeline_mode<synchronous>, transform_indices = @transform_4, window_bounds = array<i64: 32, 63>}]} {
    %c0_i32 = arith.constant 0 : i32
    %0 = arith.cmpi eq, %arg0, %c0_i32 : i32
    %1 = arith.extui %0 : i1 to i32
    %c0_i32_0 = arith.constant 0 : i32
    %2 = arith.cmpi ne, %1, %c0_i32_0 : i32
    scf.if %2 {
      %cst_9 = arith.constant 0.000000e+00 : f32
      %13 = vector.broadcast %cst_9 : f32 to vector<128x49xf32>
      %c0_10 = arith.constant 0 : index
      %c0_11 = arith.constant 0 : index
      %14 = vector.load %arg6[%c0_10, %c0_11] : memref<128x49xf32, #tpu.memory_space<vmem>>, vector<128x49xf32>
      tpu.vector_store %arg6[%c0_10, %c0_11], %13 {strides = array<i32>} : memref<128x49xf32, #tpu.memory_space<vmem>>, vector<128x49xf32>,
    } else {
    }
    %c0 = arith.constant 0 : index
    %c0_1 = arith.constant 0 : index
    %3 = vector.load %arg1[%c0, %c0_1] : memref<768x49xf32, #tpu.memory_space<vmem>>, vector<768x49xf32>
    %4 = arith.truncf %3 : vector<768x49xf32> to vector<768x49xbf16>
    %c0_2 = arith.constant 0 : index
    %c0_3 = arith.constant 0 : index
    %5 = vector.load %arg6[%c0_2, %c0_3] : memref<128x49xf32, #tpu.memory_space<vmem>>, vector<128x49xf32>
    %c0_4 = arith.constant 0 : index
    %c0_5 = arith.constant 0 : index
    %6 = vector.load %arg2[%c0_4, %c0_5] : memref<128x768xbf16, #tpu.memory_space<vmem>>, vector<128x768xbf16>
    %cst = arith.constant dense<0.000000e+00> : vector<128x49xf32>
    %7 = tpu.matmul %6, %4, %cst {dimension_numbers = #tpu.dot_dimension_numbers<[1], [0], [0], [1], [0, 0, 1, 1], [], []>} : vector<128x768xbf16>, vector<768x49xbf16>, vector<128x49xf32> -> vector<128x49xf32>
    %8 = arith.addf %5, %7 : vector<128x49xf32>
    %c0_6 = arith.constant 0 : index
    %c0_7 = arith.constant 0 : index
    %9 = vector.load %arg6[%c0_6, %c0_7] : memref<128x49xf32, #tpu.memory_space<vmem>>, vector<128x49xf32>
    tpu.vector_store %arg6[%c0_6, %c0_7], %8 {strides = array<i32>} : memref<128x49xf32, #tpu.memory_space<vmem>>, vector<128x49xf32>,
    %c1_i32 = arith.constant 1 : i32
    %10 = arith.cmpi eq, %arg0, %c1_i32 : i32
    %11 = arith.extui %10 : i1 to i32
    %c0_i32_8 = arith.constant 0 : i32
    %12 = arith.cmpi ne, %11, %c0_i32_8 : i32
    scf.if %12 {
      %c0_9 = arith.constant 0 : index
      %c0_10 = arith.constant 0 : index
      %13 = vector.load %arg6[%c0_9, %c0_10] : memref<128x49xf32, #tpu.memory_space<vmem>>, vector<128x49xf32>
      %cst_11 = arith.constant dense<0.000000e+00> : vector<128xf32>
      %14 = vector.multi_reduction <add>, %13, %cst_11 [1] : vector<128x49xf32> to vector<128xf32>
      %15 = vector.shape_cast %14 : vector<128xf32> to vector<128x1xf32>
      %cst_12 = arith.constant 4.900000e+01 : f32
      %16 = vector.broadcast %cst_12 : f32 to vector<128x1xf32>
      %17 = arith.divf %15, %16 : vector<128x1xf32>
      %18 = vector.broadcast %17 : vector<128x1xf32> to vector<128x49xf32>
      %19 = arith.subf %13, %18 : vector<128x49xf32>
      %20 = arith.mulf %19, %19 : vector<128x49xf32>
      %cst_13 = arith.constant dense<0.000000e+00> : vector<128xf32>
      %21 = vector.multi_reduction <add>, %20, %cst_13 [1] : vector<128x49xf32> to vector<128xf32>
      %22 = vector.shape_cast %21 : vector<128xf32> to vector<128x1xf32>
      %cst_14 = arith.constant 4.900000e+01 : f32
      %23 = vector.broadcast %cst_14 : f32 to vector<128x1xf32>
      %24 = arith.divf %22, %23 : vector<128x1xf32>
      %c0_15 = arith.constant 0 : index
      %c0_16 = arith.constant 0 : index
      %25 = vector.load %arg3[%c0_15, %c0_16] : memref<128x2xf32, #tpu.memory_space<vmem>>, vector<128x1xf32>
      %cst_17 = arith.constant 9.99999974E-6 : f32
      %26 = vector.broadcast %cst_17 : f32 to vector<128x1xf32>
      %27 = arith.addf %24, %26 : vector<128x1xf32>
      %28 = math.rsqrt %27 : vector<128x1xf32>
      %29 = arith.mulf %25, %28 : vector<128x1xf32>
      %c0_18 = arith.constant 0 : index
      %c1 = arith.constant 1 : index
      %30 = vector.load %arg3[%c0_18, %c1] : memref<128x2xf32, #tpu.memory_space<vmem>>, vector<128x1xf32>
      %31 = arith.mulf %17, %29 : vector<128x1xf32>
      %32 = arith.subf %30, %31 : vector<128x1xf32>
      %33 = vector.broadcast %29 : vector<128x1xf32> to vector<128x49xf32>
      %34 = arith.mulf %13, %33 : vector<128x49xf32>
      %35 = vector.broadcast %32 : vector<128x1xf32> to vector<128x49xf32>
      %36 = arith.addf %34, %35 : vector<128x49xf32>
      %cst_19 = arith.constant 0.000000e+00 : f32
      %37 = vector.broadcast %cst_19 : f32 to vector<128x49xf32>
      %38 = arith.maximumf %36, %37 : vector<128x49xf32>
      %39 = arith.truncf %38 : vector<128x49xf32> to vector<128x49xbf16>
      %cst_20 = arith.constant 0.000000e+00 : bf16
      %40 = vector.broadcast %cst_20 : bf16 to vector<128x81xbf16>
      %c0_21 = arith.constant 0 : index
      %c0_22 = arith.constant 0 : index
      %41 = vector.load %arg7[%c0_21, %c0_22] : memref<128x81xbf16, #tpu.memory_space<vmem>>, vector<128x81xbf16>
      tpu.vector_store %arg7[%c0_21, %c0_22], %40 {strides = array<i32>} : memref<128x81xbf16, #tpu.memory_space<vmem>>, vector<128x81xbf16>,
      %42 = vector.extract_strided_slice %39 {offsets = [0, 0], sizes = [128, 7], strides = [1, 1]} : vector<128x49xbf16> to vector<128x7xbf16>
      %c0_23 = arith.constant 0 : index
      %c10 = arith.constant 10 : index
      %43 = vector.load %arg7[%c0_23, %c10] : memref<128x81xbf16, #tpu.memory_space<vmem>>, vector<128x7xbf16>
      tpu.vector_store %arg7[%c0_23, %c10], %42 {strides = array<i32>} : memref<128x81xbf16, #tpu.memory_space<vmem>>, vector<128x7xbf16>,
      %44 = vector.extract_strided_slice %39 {offsets = [0, 7], sizes = [128, 7], strides = [1, 1]} : vector<128x49xbf16> to vector<128x7xbf16>
      %c0_24 = arith.constant 0 : index
      %c19 = arith.constant 19 : index
      %45 = vector.load %arg7[%c0_24, %c19] : memref<128x81xbf16, #tpu.memory_space<vmem>>, vector<128x7xbf16>
      tpu.vector_store %arg7[%c0_24, %c19], %44 {strides = array<i32>} : memref<128x81xbf16, #tpu.memory_space<vmem>>, vector<128x7xbf16>,
      %46 = vector.extract_strided_slice %39 {offsets = [0, 14], sizes = [128, 7], strides = [1, 1]} : vector<128x49xbf16> to vector<128x7xbf16>
      %c0_25 = arith.constant 0 : index
      %c28 = arith.constant 28 : index
      %47 = vector.load %arg7[%c0_25, %c28] : memref<128x81xbf16, #tpu.memory_space<vmem>>, vector<128x7xbf16>
      tpu.vector_store %arg7[%c0_25, %c28], %46 {strides = array<i32>} : memref<128x81xbf16, #tpu.memory_space<vmem>>, vector<128x7xbf16>,
      %48 = vector.extract_strided_slice %39 {offsets = [0, 21], sizes = [128, 7], strides = [1, 1]} : vector<128x49xbf16> to vector<128x7xbf16>
      %c0_26 = arith.constant 0 : index
      %c37 = arith.constant 37 : index
      %49 = vector.load %arg7[%c0_26, %c37] : memref<128x81xbf16, #tpu.memory_space<vmem>>, vector<128x7xbf16>
      tpu.vector_store %arg7[%c0_26, %c37], %48 {strides = array<i32>} : memref<128x81xbf16, #tpu.memory_space<vmem>>, vector<128x7xbf16>,
      %50 = vector.extract_strided_slice %39 {offsets = [0, 28], sizes = [128, 7], strides = [1, 1]} : vector<128x49xbf16> to vector<128x7xbf16>
      %c0_27 = arith.constant 0 : index
      %c46 = arith.constant 46 : index
      %51 = vector.load %arg7[%c0_27, %c46] : memref<128x81xbf16, #tpu.memory_space<vmem>>, vector<128x7xbf16>
      tpu.vector_store %arg7[%c0_27, %c46], %50 {strides = array<i32>} : memref<128x81xbf16, #tpu.memory_space<vmem>>, vector<128x7xbf16>,
      %52 = vector.extract_strided_slice %39 {offsets = [0, 35], sizes = [128, 7], strides = [1, 1]} : vector<128x49xbf16> to vector<128x7xbf16>
      %c0_28 = arith.constant 0 : index
      %c55 = arith.constant 55 : index
      %53 = vector.load %arg7[%c0_28, %c55] : memref<128x81xbf16, #tpu.memory_space<vmem>>, vector<128x7xbf16>
      tpu.vector_store %arg7[%c0_28, %c55], %52 {strides = array<i32>} : memref<128x81xbf16, #tpu.memory_space<vmem>>, vector<128x7xbf16>,
      %54 = vector.extract_strided_slice %39 {offsets = [0, 42], sizes = [128, 7], strides = [1, 1]} : vector<128x49xbf16> to vector<128x7xbf16>
      %c0_29 = arith.constant 0 : index
      %c64 = arith.constant 64 : index
      %55 = vector.load %arg7[%c0_29, %c64] : memref<128x81xbf16, #tpu.memory_space<vmem>>, vector<128x7xbf16>
      tpu.vector_store %arg7[%c0_29, %c64], %54 {strides = array<i32>} : memref<128x81xbf16, #tpu.memory_space<vmem>>, vector<128x7xbf16>,
      %c0_30 = arith.constant 0 : index
      %c0_31 = arith.constant 0 : index
      %56 = vector.load %arg4[%c0_30, %c0_31] : memref<288x128xbf16, #tpu.memory_space<vmem>>, vector<288x128xbf16>
      %c0_32 = arith.constant 0 : index
      %c0_33 = arith.constant 0 : index
      %57 = vector.load %arg7[%c0_32, %c0_33] : memref<128x81xbf16, #tpu.memory_space<vmem>>, vector<128x81xbf16>
      %cst_34 = arith.constant dense<0.000000e+00> : vector<288x81xf32>
      %58 = tpu.matmul %56, %57, %cst_34 {dimension_numbers = #tpu.dot_dimension_numbers<[1], [0], [0], [1], [0, 0, 1, 1], [], []>} : vector<288x128xbf16>, vector<128x81xbf16>, vector<288x81xf32> -> vector<288x81xf32>
      %59 = vector.extract_strided_slice %58 {offsets = [0, 0], sizes = [32, 61], strides = [1, 1]} : vector<288x81xf32> to vector<32x61xf32>
      %60 = vector.extract_strided_slice %58 {offsets = [32, 1], sizes = [32, 61], strides = [1, 1]} : vector<288x81xf32> to vector<32x61xf32>
      %61 = arith.addf %59, %60 : vector<32x61xf32>
      %62 = vector.extract_strided_slice %58 {offsets = [64, 2], sizes = [32, 61], strides = [1, 1]} : vector<288x81xf32> to vector<32x61xf32>
      %63 = arith.addf %61, %62 : vector<32x61xf32>
      %64 = vector.extract_strided_slice %58 {offsets = [96, 9], sizes = [32, 61], strides = [1, 1]} : vector<288x81xf32> to vector<32x61xf32>
      %65 = arith.addf %63, %64 : vector<32x61xf32>
      %66 = vector.extract_strided_slice %58 {offsets = [128, 10], sizes = [32, 61], strides = [1, 1]} : vector<288x81xf32> to vector<32x61xf32>
      %67 = arith.addf %65, %66 : vector<32x61xf32>
      %68 = vector.extract_strided_slice %58 {offsets = [160, 11], sizes = [32, 61], strides = [1, 1]} : vector<288x81xf32> to vector<32x61xf32>
      %69 = arith.addf %67, %68 : vector<32x61xf32>
      %70 = vector.extract_strided_slice %58 {offsets = [192, 18], sizes = [32, 61], strides = [1, 1]} : vector<288x81xf32> to vector<32x61xf32>
      %71 = arith.addf %69, %70 : vector<32x61xf32>
      %72 = vector.extract_strided_slice %58 {offsets = [224, 19], sizes = [32, 61], strides = [1, 1]} : vector<288x81xf32> to vector<32x61xf32>
      %73 = arith.addf %71, %72 : vector<32x61xf32>
      %74 = vector.extract_strided_slice %58 {offsets = [256, 20], sizes = [32, 61], strides = [1, 1]} : vector<288x81xf32> to vector<32x61xf32>
      %75 = arith.addf %73, %74 : vector<32x61xf32>
      %c0_35 = arith.constant 0 : index
      %c0_36 = arith.constant 0 : index
      %76 = vector.load %arg5[%c0_35, %c0_36] : memref<32x63xf32, #tpu.memory_space<vmem>>, vector<32x61xf32>
      tpu.vector_store %arg5[%c0_35, %c0_36], %75 {strides = array<i32>} : memref<32x63xf32, #tpu.memory_space<vmem>>, vector<32x61xf32>,
      %cst_37 = arith.constant 0.000000e+00 : f32
      %77 = vector.broadcast %cst_37 : f32 to vector<32x2xf32>
      %c0_38 = arith.constant 0 : index
      %c61 = arith.constant 61 : index
      %78 = vector.load %arg5[%c0_38, %c61] : memref<32x63xf32, #tpu.memory_space<vmem>>, vector<32x2xf32>
      tpu.vector_store %arg5[%c0_38, %c61], %77 {strides = array<i32>} : memref<32x63xf32, #tpu.memory_space<vmem>>, vector<32x2xf32>,
    } else {
    }
    return
  }
  func.func @transform_0(%arg0: i32) -> (i32, i32) {
    %c0_i32 = arith.constant 0 : i32
    %c0_i32_0 = arith.constant 0 : i32
    return %arg0, %c0_i32 : i32, i32
  }
  func.func @transform_1(%arg0: i32) -> (i32, i32) {
    %c0_i32 = arith.constant 0 : i32
    %c0_i32_0 = arith.constant 0 : i32
    return %c0_i32, %arg0 : i32, i32
  }
  func.func @transform_2(%arg0: i32) -> (i32, i32) {
    %c0_i32 = arith.constant 0 : i32
    %c0_i32_0 = arith.constant 0 : i32
    %c0_i32_1 = arith.constant 0 : i32
    return %c0_i32, %c0_i32_0 : i32, i32
  }
  func.func @transform_3(%arg0: i32) -> (i32, i32) {
    %c0_i32 = arith.constant 0 : i32
    %c0_i32_0 = arith.constant 0 : i32
    %c0_i32_1 = arith.constant 0 : i32
    return %c0_i32, %c0_i32_0 : i32, i32
  }
  func.func @transform_4(%arg0: i32) -> (i32, i32) {
    %c0_i32 = arith.constant 0 : i32
    %c0_i32_0 = arith.constant 0 : i32
    %c0_i32_1 = arith.constant 0 : i32
    return %c0_i32, %c0_i32_0 : i32, i32
  }
}

</mosaic_0001>

<bundles_post_ra>
// kernel: forward.1
= control target key start
LH: loop header
LB: loop body
LE: loop exit
PB: predicated region body
PF: predicated region fallthrough
CT: control target
= control target key end

     0   :  { %s3084_s15 = smov 0   ;;  %s3086_s16 = smov 0   ;;  %s4053_s0 = inlined_call_operand.vmem [shape: f32[1536,49], index: 0, kind: input, shape index: {}]   ;;  %s4054_s1 = inlined_call_operand.vmem [shape: bf16[128,1536], index: 1, kind: input, shape index: {}]   ;;  %s4055_s2 = inlined_call_operand.vmem [shape: f32[128,2], index: 2, kind: input, shape index: {}]   ;;  %s4056_s3 = inlined_call_operand.vmem [shape: bf16[288,128], index: 3, kind: input, shape index: {}]   ;;  %s4057_s4 = inlined_call_operand.vmem [shape: f32[32,63], index: 4, kind: output, shape index: {}]  }
   0x1   :  { %s3088_s17 = smov 0  }
   0x2 LB: > { %s3100_s18 = sadd.s32 4294967295, %s3037_s17   ;;  %s3103_s19 = sadd.s32 1, %s3037_s17   ;;  %s3037_s17 = sphi %s3088_s17, %s4063_s17   ;;  %s3033_s16 = sphi %s3086_s16, %s4062_s16   ;;  %s3029_s15 = sphi %s3084_s15, %s4061_s15  }
   0x3   : > { %s44_s20 = ssub.s32 %s3037_s17, %s3103_s19  ;;  %s47_s21 = sadd.s32 1, %s3033_s16 }
   0x4   : > { %p45_p0 = scmp.eq.s32.totalorder %s44_s20, 0  ;;  %p54_p1 = scmp.ne.s32.totalorder %s3033_s16, %s3029_s15 }
   0x5   : > { %p55_p2 = scmp.eq.s32.totalorder %s3037_s17, 0  ;;  %p2466_p4 = scmp.ge.s32.totalorder %s3037_s17, 2 }
   0x6   : > { %s3112_s22 = scalar_select %p45_p0, %s3033_s16, %s47_s21  }
   0x7   : > { %p56_p3 = por %p55_p2, %p54_p1  ;;  %149 = sbr.rel (%p2466_p4) target bundleno = 43 (0x2b), region = 24 }
   0xe   : > { %161 = sbr.rel (!%p56_p3) target bundleno = 43 (0x2b), region = 32  ;;  %s163_s23 = sand.u32 (%p56_p3), 1, %s3033_s16  }
   0xf   : > { %s2540_s24 = smul.u32 (%p56_p3), 24, %s3037_s17 }
  0x10   : > { %s2843_s25 = smul.u32 (%p56_p3), 384, %s163_s23 }
  0x11   : > { %s3120_s28 = scalar_lea.vmem (%p56_p3), %s4054_s1, %s2540_s24 }
  0x12   : > { %v181_v0 = vld [vmem:[%s3120_s28] sm:$0xff] (%p56_p3)  ;;  %v183_v1 = vld [vmem:[%s3120_s28 + $0x8] sm:$0xff] (%p56_p3)  ;;  %v185_v2 = vld [vmem:[%s3120_s28 + $0x10] sm:$0xff] (%p56_p3)  ;;  %s3125_s29 = scalar_lea.vmem (%p56_p3), [#allocation4], %s2843_s25 }
  0x13   : > { %182 = vst [vmem:[%s3125_s29] sm:$0xff] (%p56_p3), %v181_v0  ;;  %184 = vst [vmem:[%s3125_s29 + $0x8] sm:$0xff] (%p56_p3), %v183_v1  ;;  %v187_v3 = vld [vmem:[%s3120_s28 + $0x30] sm:$0xff] (%p56_p3)  ;;  %v189_v4 = vld [vmem:[%s3120_s28 + $0x38] sm:$0xff] (%p56_p3) }
  0x14   : > { %186 = vst [vmem:[%s3125_s29 + $0x10] sm:$0xff] (%p56_p3), %v185_v2  ;;  %v191_v5 = vld [vmem:[%s3120_s28 + $0x40] sm:$0xff] (%p56_p3)  ;;  %188 = vst [vmem:[%s3125_s29 + $0x18] sm:$0xff] (%p56_p3), %v187_v3  ;;  %v195_v7 = vld [vmem:[%s3120_s28 + $0x68] sm:$0xff] (%p56_p3) }
  0x15   : > { %190 = vst [vmem:[%s3125_s29 + $0x20] sm:$0xff] %v189_v4  ;;  %192 = vst [vmem:[%s3125_s29 + $0x28] sm:$0xff] %v191_v5  ;;  %v193_v6 = vld [vmem:[%s3120_s28 + $0x60] sm:$0xff]  ;;  %v197_v8 = vld [vmem:[%s3120_s28 + $0x70] sm:$0xff] }
  0x16   : > { %194 = vst [vmem:[%s3125_s29 + $0x30] sm:$0xff] %v193_v6  ;;  %196 = vst [vmem:[%s3125_s29 + $0x38] sm:$0xff] %v195_v7  ;;  %v199_v9 = vld [vmem:[%s3120_s28 + $0x90] sm:$0xff]  ;;  %v201_v10 = vld [vmem:[%s3120_s28 + $0x98] sm:$0xff] }
  0x17   : > { %198 = vst [vmem:[%s3125_s29 + $0x40] sm:$0xff] %v197_v8  ;;  %v203_v11 = vld [vmem:[%s3120_s28 + $0xa0] sm:$0xff]  ;;  %200 = vst [vmem:[%s3125_s29 + $0x48] sm:$0xff] %v199_v9  ;;  %v207_v13 = vld [vmem:[%s3120_s28 + $0xc8] sm:$0xff] }
  0x18   : > { %202 = vst [vmem:[%s3125_s29 + $0x50] sm:$0xff] %v201_v10  ;;  %204 = vst [vmem:[%s3125_s29 + $0x58] sm:$0xff] %v203_v11  ;;  %v205_v12 = vld [vmem:[%s3120_s28 + $0xc0] sm:$0xff]  ;;  %v209_v14 = vld [vmem:[%s3120_s28 + $0xd0] sm:$0xff] }
  0x19   : > { %206 = vst [vmem:[%s3125_s29 + $0x60] sm:$0xff] %v205_v12  ;;  %208 = vst [vmem:[%s3125_s29 + $0x68] sm:$0xff] %v207_v13  ;;  %v211_v15 = vld [vmem:[%s3120_s28 + $0xf0] sm:$0xff]  ;;  %v213_v16 = vld [vmem:[%s3120_s28 + $0xf8] sm:$0xff] }
  0x1a   : > { %210 = vst [vmem:[%s3125_s29 + $0x70] sm:$0xff] %v209_v14  ;;  %v215_v17 = vld [vmem:[%s3120_s28 + $0x100] sm:$0xff]  ;;  %212 = vst [vmem:[%s3125_s29 + $0x78] sm:$0xff] %v211_v15  ;;  %v219_v19 = vld [vmem:[%s3120_s28 + $0x128] sm:$0xff] }
  0x1b   : > { %214 = vst [vmem:[%s3125_s29 + $0x80] sm:$0xff] %v213_v16  ;;  %216 = vst [vmem:[%s3125_s29 + $0x88] sm:$0xff] %v215_v17  ;;  %v217_v18 = vld [vmem:[%s3120_s28 + $0x120] sm:$0xff]  ;;  %v221_v20 = vld [vmem:[%s3120_s28 + $0x130] sm:$0xff] }
  0x1c   : > { %218 = vst [vmem:[%s3125_s29 + $0x90] sm:$0xff] %v217_v18  ;;  %220 = vst [vmem:[%s3125_s29 + $0x98] sm:$0xff] %v219_v19  ;;  %v223_v21 = vld [vmem:[%s3120_s28 + $0x150] sm:$0xff]  ;;  %v225_v22 = vld [vmem:[%s3120_s28 + $0x158] sm:$0xff] }
  0x1d   : > { %222 = vst [vmem:[%s3125_s29 + $0xa0] sm:$0xff] %v221_v20  ;;  %v227_v23 = vld [vmem:[%s3120_s28 + $0x160] sm:$0xff]  ;;  %224 = vst [vmem:[%s3125_s29 + $0xa8] sm:$0xff] %v223_v21  ;;  %v231_v25 = vld [vmem:[%s3120_s28 + $0x188] sm:$0xff] }
  0x1e   : > { %226 = vst [vmem:[%s3125_s29 + $0xb0] sm:$0xff] %v225_v22  ;;  %228 = vst [vmem:[%s3125_s29 + $0xb8] sm:$0xff] %v227_v23  ;;  %v229_v24 = vld [vmem:[%s3120_s28 + $0x180] sm:$0xff]  ;;  %v233_v26 = vld [vmem:[%s3120_s28 + $0x190] sm:$0xff] }
  0x1f   : > { %230 = vst [vmem:[%s3125_s29 + $0xc0] sm:$0xff] %v229_v24  ;;  %232 = vst [vmem:[%s3125_s29 + $0xc8] sm:$0xff] %v231_v25  ;;  %v235_v27 = vld [vmem:[%s3120_s28 + $0x1b0] sm:$0xff]  ;;  %v237_v28 = vld [vmem:[%s3120_s28 + $0x1b8] sm:$0xff] }
  0x20   : > { %234 = vst [vmem:[%s3125_s29 + $0xd0] sm:$0xff] %v233_v26  ;;  %v239_v29 = vld [vmem:[%s3120_s28 + $0x1c0] sm:$0xff]  ;;  %236 = vst [vmem:[%s3125_s29 + $0xd8] sm:$0xff] %v235_v27  ;;  %v243_v31 = vld [vmem:[%s3120_s28 + $0x1e8] sm:$0xff] }
  0x21   : > { %238 = vst [vmem:[%s3125_s29 + $0xe0] sm:$0xff] %v237_v28  ;;  %240 = vst [vmem:[%s3125_s29 + $0xe8] sm:$0xff] %v239_v29  ;;  %v241_v30 = vld [vmem:[%s3120_s28 + $0x1e0] sm:$0xff]  ;;  %v245_v32 = vld [vmem:[%s3120_s28 + $0x1f0] sm:$0xff] }
  0x22   : > { %242 = vst [vmem:[%s3125_s29 + $0xf0] sm:$0xff] %v241_v30  ;;  %244 = vst [vmem:[%s3125_s29 + $0xf8] sm:$0xff] %v243_v31  ;;  %v247_v33 = vld [vmem:[%s3120_s28 + $0x210] sm:$0xff]  ;;  %v249_v34 = vld [vmem:[%s3120_s28 + $0x218] sm:$0xff] }
  0x23   : > { %246 = vst [vmem:[%s3125_s29 + $0x100] sm:$0xff] %v245_v32  ;;  %v251_v35 = vld [vmem:[%s3120_s28 + $0x220] sm:$0xff]  ;;  %248 = vst [vmem:[%s3125_s29 + $0x108] sm:$0xff] %v247_v33  ;;  %v255_v37 = vld [vmem:[%s3120_s28 + $0x248] sm:$0xff] }
  0x24   : > { %250 = vst [vmem:[%s3125_s29 + $0x110] sm:$0xff] %v249_v34  ;;  %252 = vst [vmem:[%s3125_s29 + $0x118] sm:$0xff] %v251_v35  ;;  %v253_v36 = vld [vmem:[%s3120_s28 + $0x240] sm:$0xff]  ;;  %v257_v38 = vld [vmem:[%s3120_s28 + $0x250] sm:$0xff] }
  0x25   : > { %254 = vst [vmem:[%s3125_s29 + $0x120] sm:$0xff] %v253_v36  ;;  %256 = vst [vmem:[%s3125_s29 + $0x128] sm:$0xff] %v255_v37  ;;  %v259_v39 = vld [vmem:[%s3120_s28 + $0x270] sm:$0xff]  ;;  %v261_v40 = vld [vmem:[%s3120_s28 + $0x278] sm:$0xff] }
  0x26   : > { %258 = vst [vmem:[%s3125_s29 + $0x130] sm:$0xff] %v257_v38  ;;  %v263_v41 = vld [vmem:[%s3120_s28 + $0x280] sm:$0xff]  ;;  %260 = vst [vmem:[%s3125_s29 + $0x138] sm:$0xff] %v259_v39  ;;  %v267_v43 = vld [vmem:[%s3120_s28 + $0x2a8] sm:$0xff] }
  0x27   : > { %262 = vst [vmem:[%s3125_s29 + $0x140] sm:$0xff] %v261_v40  ;;  %264 = vst [vmem:[%s3125_s29 + $0x148] sm:$0xff] %v263_v41  ;;  %v265_v42 = vld [vmem:[%s3120_s28 + $0x2a0] sm:$0xff]  ;;  %v269_v44 = vld [vmem:[%s3120_s28 + $0x2b0] sm:$0xff] }
  0x28   : > { %266 = vst [vmem:[%s3125_s29 + $0x150] sm:$0xff] %v265_v42  ;;  %268 = vst [vmem:[%s3125_s29 + $0x158] sm:$0xff] %v267_v43  ;;  %v271_v45 = vld [vmem:[%s3120_s28 + $0x2d0] sm:$0xff]  ;;  %v273_v46 = vld [vmem:[%s3120_s28 + $0x2d8] sm:$0xff] }
  0x29   : > { %270 = vst [vmem:[%s3125_s29 + $0x160] sm:$0xff] %v269_v44  ;;  %v275_v47 = vld [vmem:[%s3120_s28 + $0x2e0] sm:$0xff]  ;;  %272 = vst [vmem:[%s3125_s29 + $0x168] sm:$0xff] %v271_v45 }
  0x2a   : > { %274 = vst [vmem:[%s3125_s29 + $0x170] sm:$0xff] %v273_v46  ;;  %276 = vst [vmem:[%s3125_s29 + $0x178] sm:$0xff] %v275_v47 }
  0x2b PF: > { %p2468_p5 = scmp.ge.s32.totalorder %s3037_s17, 1  ;;  %p281_p6 = scmp.lt.s32.totalorder %s3037_s17, 3 }
  0x2d   : > { %p282_p7 = pnand %p2468_p5, %p281_p6 }
  0x2e   : > { %s288_s30 = sand.u32 (!%p282_p7), 1, %s3029_s15   ;;  %s313_s5 = smul.u32 (!%p282_p7), 96, %s3100_s18 }
  0x2f   : > { %285 = sbr.rel (%p282_p7) target bundleno = 1658 (0x67a), region = 55  ;;  %p2470_p9 = scmp.ne.s32.totalorder (!%p282_p7), %s3100_s18, 0 }
  0x30   : > { %s2844_s6 = smul.u32 (!%p282_p7), 384, %s288_s30  ;;  %p314_p8 = scmp.lt.s32.totalorder (!%p282_p7), %s313_s5, 191 }
  0x32   : > { %s3229_s11 = scalar_lea.vmem (!%p282_p7), [#allocation4], %s2844_s6 }
  0x36   : > { %s4065_s5 = smov (!%p314_p8, %s313_s5), 191  ;;  %324 = sbr.rel (%p2470_p9) target bundleno = 64 (0x40), region = 63 }
  0x37   : > { %s2469_s7 = sshll.u32 %s4065_s5, 3  ;;  %vm325_vm0 = vcmask (!%p2470_p9), 400384   ;;  %v3039_v48 = vmov (!%p2470_p9), 0.0  }
  0x38   : > { %s3227_s10 = scalar_lea.vmem %s4053_s0, %s2469_s7  ;;  %326 = vst.msk [vmem:[#allocation2] sm:$0xff] (!%p2470_p9), %vm325_vm0, %v3039_v48  ;;  %327 = vst.msk [vmem:[#allocation2 + $0x8] sm:$0xff] (!%p2470_p9), %vm325_vm0, %v3039_v48 }
  0x39   : > { %328 = vst.msk [vmem:[#allocation2 + $0x10] sm:$0xff] (!%p2470_p9), %vm325_vm0, %v3039_v48  ;;  %329 = vst.msk [vmem:[#allocation2 + $0x18] sm:$0xff] (!%p2470_p9), %vm325_vm0, %v3039_v48 }
  0x3a   : > { %330 = vst.msk [vmem:[#allocation2 + $0x20] sm:$0xff] (!%p2470_p9), %vm325_vm0, %v3039_v48  ;;  %331 = vst.msk [vmem:[#allocation2 + $0x28] sm:$0xff] (!%p2470_p9), %vm325_vm0, %v3039_v48 }
  0x3b   : > { %332 = vst.msk [vmem:[#allocation2 + $0x30] sm:$0xff] (!%p2470_p9), %vm325_vm0, %v3039_v48  ;;  %333 = vst.msk [vmem:[#allocation2 + $0x38] sm:$0xff] (!%p2470_p9), %vm325_vm0, %v3039_v48 }
  0x3c   : > { %334 = vst.msk [vmem:[#allocation2 + $0x40] sm:$0xff] (!%p2470_p9), %vm325_vm0, %v3039_v48  ;;  %335 = vst.msk [vmem:[#allocation2 + $0x48] sm:$0xff] (!%p2470_p9), %vm325_vm0, %v3039_v48 }
  0x3d   : > { %336 = vst.msk [vmem:[#allocation2 + $0x50] sm:$0xff] %vm325_vm0, %v3039_v48  ;;  %337 = vst.msk [vmem:[#allocation2 + $0x58] sm:$0xff] %vm325_vm0, %v3039_v48 }
  0x3e   : > { %338 = vst.msk [vmem:[#allocation2 + $0x60] sm:$0xff] %vm325_vm0, %v3039_v48  ;;  %339 = vst.msk [vmem:[#allocation2 + $0x68] sm:$0xff] %vm325_vm0, %v3039_v48 }
  0x3f   : > { %340 = vst.msk [vmem:[#allocation2 + $0x70] sm:$0xff] %vm325_vm0, %v3039_v48  ;;  %341 = vst.msk [vmem:[#allocation2 + $0x78] sm:$0xff] %vm325_vm0, %v3039_v48 }
  0x40 PF: > { %v358_v49 = vld [vmem:[%s3227_s10 + $0x80] sm:$0xff]  ;;  %v359_v50 = vld [vmem:[%s3227_s10 + $0x88] sm:$0xff]  ;;  %v360_v54 = vld [vmem:[%s3227_s10 + $0x90] sm:$0xff]  ;;  %vm1097_vm1 = vcmask 400384   ;;  %p2519_p10 = scmp.ne.s32.totalorder %s3100_s18, 1 }
  0x41   : > { %v342_v51 = vld [vmem:[%s3227_s10] sm:$0xff]  ;;  %v446_v52 = vpack.c.bf16 %v359_v50, %v358_v49  ;;  %v343_v53 = vld [vmem:[%s3227_s10 + $0x8] sm:$0xff]  ;;  %v361_v55 = vld [vmem:[%s3227_s10 + $0x98] sm:$0xff]  ;;  %s3041_s13 = smov (!%p2519_p10), 1   ;;  %vm1671_vm2 = vcmask (!%p2519_p10), 662528   ;;  %s3043_s25 = smov (!%p2519_p10), 12  }
  0x42   : > { %v438_v56 = vpack.c.bf16 %v343_v53, %v342_v51  ;;  %v447_v57 = vpack.c.bf16 %v361_v55, %v360_v54  ;;  %v344_v58 = vld [vmem:[%s3227_s10 + $0x10] sm:$0xff]  ;;  %v345_v59 = vld [vmem:[%s3227_s10 + $0x18] sm:$0xff]  ;;  %v362_v60 = vld [vmem:[%s3227_s10 + $0xa0] sm:$0xff]  ;;  %s3044_s26 = smov (!%p2519_p10), 10   ;;  %s3045_s27 = smov (!%p2519_p10), 16   ;;  %vm1712_vm3 = vcmask (!%p2519_p10), 138320  }
  0x43   : > { %2541 = vmatprep.subr.bf16.mxu0 %v446_v52  ;;  %2811 = vmatprep.subr.bf16.mxu1 %v446_v52  ;;  %v363_v61 = vld [vmem:[%s3227_s10 + $0xa8] sm:$0xff]  ;;  %v439_v62 = vpack.c.bf16 %v345_v59, %v344_v58  ;;  %v346_v0 = vld [vmem:[%s3227_s10 + $0x20] sm:$0xff]  ;;  %v364_v2 = vld [vmem:[%s3227_s10 + $0xb0] sm:$0xff]  ;;  %s3046_s28 = smov (!%p2519_p10), 14   ;;  %s3047_s29 = smov (!%p2519_p10), 18   ;;  %vm1745_vm4 = vcmask (!%p2519_p10), 212120  }
  0x44   : > { %2542 = vmatpush3.bf16.msra.mxu0 %v438_v56  ;;  %2819 = vmatpush3.bf16.msra.mxu1 %v438_v56  ;;  %v448_v63 = vpack.c.bf16 %v363_v61, %v362_v60  ;;  %v347_v1 = vld [vmem:[%s3227_s10 + $0x28] sm:$0xff]  ;;  %v365_v3 = vld [vmem:[%s3227_s10 + $0xb8] sm:$0xff]  ;;  %v348_v6 = vld [vmem:[%s3227_s10 + $0x30] sm:$0xff]  ;;  %s3048_s30 = smov (!%p2519_p10), 20   ;;  %s3049_s5 = smov (!%p2519_p10), 22   ;;  %vm1778_vm5 = vcmask (!%p2519_p10), 285920  }
  0x45   : > { %2543 = vmatprep.subr.bf16.mxu0 %v447_v57  ;;  %2812 = vmatprep.subr.bf16.mxu1 %v447_v57  ;;  %v440_v4 = vpack.c.bf16 %v347_v1, %v346_v0  ;;  %v449_v5 = vpack.c.bf16 %v365_v3, %v364_v2  ;;  %v349_v7 = vld [vmem:[%s3227_s10 + $0x38] sm:$0xff]  ;;  %v366_v8 = vld [vmem:[%s3227_s10 + $0xc0] sm:$0xff]  ;;  %v367_v9 = vld [vmem:[%s3227_s10 + $0xc8] sm:$0xff]  ;;  %vm1811_vm6 = vcmask (!%p2519_p10), 359720   ;;  %vm1844_vm7 = vcmask (!%p2519_p10), 433520   ;;  %s3050_s21 = smov (!%p2519_p10), 117  }
  0x46   : > { %v2891_v10 = vld [vmem:[%s3229_s11 + $0x4] ss:$24 sps:$4 sm:$0xff]   ;;  %v441_v11 = vpack.c.bf16 %v349_v7, %v348_v6  ;;  %v450_v12 = vpack.c.bf16 %v367_v9, %v366_v8  ;;  %v351_v14 = vld [vmem:[%s3227_s10 + $0x48] sm:$0xff]  ;;  %v368_v16 = vld [vmem:[%s3227_s10 + $0xd0] sm:$0xff]  ;;  %vm1877_vm8 = vcmask (!%p2519_p10), 507320   ;;  %vm1910_vm9 = vcmask (!%p2519_p10), 581120  }
  0x47   : > { %v350_v13 = vld [vmem:[%s3227_s10 + $0x40] sm:$0xff]  ;;  %v369_v17 = vld [vmem:[%s3227_s10 + $0xd8] sm:$0xff]  ;;  %822 = vmatprep.mubr.bf16.mxu0 %v2891_v10  ;;  %v352_v20 = vld [vmem:[%s3227_s10 + $0x50] sm:$0xff]  ;;  %s3051_s23 = smov (!%p2519_p10), 127   ;;  %s3052_s24 = smov (!%p2519_p10), 110   ;;  %vm2408_vm10 = vcmask (!%p2519_p10), 498688  }
  0x48   : > { %2544 = vmatpush3.bf16.msra.mxu0 %v439_v62  ;;  %2820 = vmatpush3.bf16.msra.mxu1 %v439_v62  ;;  %v2894_v15 = vld [vmem:[%s3229_s11 + $0xc4] ss:$24 sps:$4 sm:$0xff]   ;;  %v442_v18 = vpack.c.bf16 %v351_v14, %v350_v13  ;;  %v451_v19 = vpack.c.bf16 %v369_v17, %v368_v16  ;;  %v371_v23 = vld [vmem:[%s3227_s10 + $0xe8] sm:$0xff]  ;;  %v372_v28 = vld [vmem:[%s3227_s10 + $0xf0] sm:$0xff]  ;;  %vm2413_vm11 = vcmask (!%p2519_p10), 515560  }
  0x49   : > { %2545 = vmatprep.subr.bf16.mxu0 %v448_v63  ;;  %2813 = vmatprep.subr.bf16.mxu1 %v448_v63  ;;  %v353_v21 = vld [vmem:[%s3227_s10 + $0x58] sm:$0xff]  ;;  %v370_v22 = vld [vmem:[%s3227_s10 + $0xe0] sm:$0xff]  ;;  %v355_v27 = vld [vmem:[%s3227_s10 + $0x68] sm:$0xff] }
  0x4a   : > { %854 = vmatprep.mubr.bf16.mxu1 %v2894_v15  ;;  %v443_v24 = vpack.c.bf16 %v353_v21, %v352_v20  ;;  %v452_v25 = vpack.c.bf16 %v371_v23, %v370_v22  ;;  %v354_v26 = vld [vmem:[%s3227_s10 + $0x60] sm:$0xff]  ;;  %v373_v29 = vld [vmem:[%s3227_s10 + $0xf8] sm:$0xff]  ;;  %v356_v31 = vld [vmem:[%s3227_s10 + $0x70] sm:$0xff] }
  0x4b   : > { %v444_v30 = vpack.c.bf16 %v355_v27, %v354_v26  ;;  %v453_v32 = vpack.c.bf16 %v373_v29, %v372_v28  ;;  %v357_v33 = vld [vmem:[%s3227_s10 + $0x78] sm:$0xff]  ;;  %v390_v34 = vld [vmem:[%s3227_s10 + $0x180] sm:$0xff]  ;;  %v391_v35 = vld [vmem:[%s3227_s10 + $0x188] sm:$0xff] }
  0x4c   : > { %2546 = vmatpush3.bf16.msra.mxu0 %v440_v4  ;;  %2821 = vmatpush3.bf16.msra.mxu1 %v440_v4  ;;  %v422_v36 = vld [vmem:[%s3227_s10 + $0x280] sm:$0xff]  ;;  %v423_v37 = vld [vmem:[%s3227_s10 + $0x288] sm:$0xff]  ;;  %v445_v38 = vpack.c.bf16 %v357_v33, %v356_v31  ;;  %v462_v42 = vpack.c.bf16 %v391_v35, %v390_v34  ;;  %v392_v46 = vld [vmem:[%s3227_s10 + $0x190] sm:$0xff] }
  0x4d   : > { %2547 = vmatprep.subr.bf16.mxu0 %v449_v5  ;;  %2814 = vmatprep.subr.bf16.mxu1 %v449_v5  ;;  %v374_v39 = vld [vmem:[%s3227_s10 + $0x100] sm:$0xff]  ;;  %v375_v40 = vld [vmem:[%s3227_s10 + $0x108] sm:$0xff]  ;;  %v478_v43 = vpack.c.bf16 %v423_v37, %v422_v36  ;;  %v393_v47 = vld [vmem:[%s3227_s10 + $0x198] sm:$0xff] }
  0x4e   : > { %v2889_v41 = vld [vmem:[%s3229_s11] ss:$24 sps:$4 sm:$0xff]   ;;  %v407_v45 = vld [vmem:[%s3227_s10 + $0x208] sm:$0xff]  ;;  %v424_v48 = vld [vmem:[%s3227_s10 + $0x290] sm:$0xff]  ;;  %v454_v53 = vpack.c.bf16 %v375_v40, %v374_v39  ;;  %v463_v58 = vpack.c.bf16 %v393_v47, %v392_v46 }
  0x4f   : > { %v406_v44 = vld [vmem:[%s3227_s10 + $0x200] sm:$0xff]  ;;  %v425_v49 = vld [vmem:[%s3227_s10 + $0x298] sm:$0xff]  ;;  %v376_v51 = vld [vmem:[%s3227_s10 + $0x110] sm:$0xff] }
  0x50   : > { %2548 = vmatpush3.bf16.msra.mxu0 %v441_v11  ;;  %2822 = vmatpush3.bf16.msra.mxu1 %v441_v11  ;;  %v2892_v50 = vld [vmem:[%s3229_s11 + $0xc0] ss:$24 sps:$4 sm:$0xff]   ;;  %v470_v54 = vpack.c.bf16 %v407_v45, %v406_v44  ;;  %v408_v55 = vld [vmem:[%s3227_s10 + $0x210] sm:$0xff]  ;;  %v479_v59 = vpack.c.bf16 %v425_v49, %v424_v48  ;;  %v395_v62 = vld [vmem:[%s3227_s10 + $0x1a8] sm:$0xff] }
  0x51   : > { %2549 = vmatprep.subr.bf16.mxu0 %v450_v12  ;;  %2815 = vmatprep.subr.bf16.mxu1 %v450_v12  ;;  %v377_v52 = vld [vmem:[%s3227_s10 + $0x118] sm:$0xff]  ;;  %v2895_v57 = vld [vmem:[%s3229_s11 + $0x34] ss:$24 sps:$4 sm:$0xff]   ;;  %v394_v61 = vld [vmem:[%s3227_s10 + $0x1a0] sm:$0xff] }
  0x52   : > { %v409_v56 = vld [vmem:[%s3227_s10 + $0x218] sm:$0xff]  ;;  %v2897_v60 = vld [vmem:[%s3229_s11 + $0xf4] ss:$24 sps:$4 sm:$0xff]   ;;  %v426_v63 = vld [vmem:[%s3227_s10 + $0x2a0] sm:$0xff]  ;;  %v455_v1 = vpack.c.bf16 %v377_v52, %v376_v51  ;;  %v464_v6 = vpack.c.bf16 %v395_v62, %v394_v61 }
  0x53   : > { %v427_v0 = vld [vmem:[%s3227_s10 + $0x2a8] sm:$0xff]  ;;  %v471_v2 = vpack.c.bf16 %v409_v56, %v408_v55  ;;  %v378_v3 = vld [vmem:[%s3227_s10 + $0x120] sm:$0xff]  ;;  %v396_v10 = vld [vmem:[%s3227_s10 + $0x1b0] sm:$0xff] }
  0x54   : > { %2550 = vmatpush3.bf16.msra.mxu0 %v442_v18  ;;  %2823 = vmatpush3.bf16.msra.mxu1 %v442_v18  ;;  %v379_v4 = vld [vmem:[%s3227_s10 + $0x128] sm:$0xff]  ;;  %v480_v7 = vpack.c.bf16 %v427_v0, %v426_v63  ;;  %v410_v8 = vld [vmem:[%s3227_s10 + $0x220] sm:$0xff]  ;;  %v397_v11 = vld [vmem:[%s3227_s10 + $0x1b8] sm:$0xff] }
  0x55   : > { %2551 = vmatprep.subr.bf16.mxu0 %v451_v19  ;;  %2816 = vmatprep.subr.bf16.mxu1 %v451_v19  ;;  %v2899_v5 = vld [vmem:[%s3229_s11 + $0x30] ss:$24 sps:$4 sm:$0xff]   ;;  %v429_v13 = vld [vmem:[%s3227_s10 + $0x2b8] sm:$0xff]  ;;  %v456_v17 = vpack.c.bf16 %v379_v4, %v378_v3  ;;  %v465_v22 = vpack.c.bf16 %v397_v11, %v396_v10  ;;  %v430_v27 = vld [vmem:[%s3227_s10 + $0x2c0] sm:$0xff] }
  0x56   : > { %v411_v9 = vld [vmem:[%s3227_s10 + $0x228] sm:$0xff]  ;;  %v428_v12 = vld [vmem:[%s3227_s10 + $0x2b0] sm:$0xff]  ;;  %v381_v16 = vld [vmem:[%s3227_s10 + $0x138] sm:$0xff] }
  0x57   : > { %v2900_v14 = vld [vmem:[%s3229_s11 + $0xf0] ss:$24 sps:$4 sm:$0xff]   ;;  %v472_v18 = vpack.c.bf16 %v411_v9, %v410_v8  ;;  %v413_v20 = vld [vmem:[%s3227_s10 + $0x238] sm:$0xff]  ;;  %v481_v23 = vpack.c.bf16 %v429_v13, %v428_v12  ;;  %v382_v29 = vld [vmem:[%s3227_s10 + $0x140] sm:$0xff] }
  0x58   : > { %2552 = vmatpush3.bf16.msra.mxu0 %v443_v24  ;;  %2824 = vmatpush3.bf16.msra.mxu1 %v443_v24  ;;  %v380_v15 = vld [vmem:[%s3227_s10 + $0x130] sm:$0xff]  ;;  %v2901_v21 = vld [vmem:[%s3229_s11 + $0x64] ss:$24 sps:$4 sm:$0xff]   ;;  %v399_v26 = vld [vmem:[%s3227_s10 + $0x1c8] sm:$0xff] }
  0x59   : > { %2553 = vmatprep.subr.bf16.mxu0 %v452_v25  ;;  %2817 = vmatprep.subr.bf16.mxu1 %v452_v25  ;;  %v412_v19 = vld [vmem:[%s3227_s10 + $0x230] sm:$0xff]  ;;  %v2903_v24 = vld [vmem:[%s3229_s11 + $0x124] ss:$24 sps:$4 sm:$0xff]   ;;  %v431_v28 = vld [vmem:[%s3227_s10 + $0x2c8] sm:$0xff]  ;;  %v457_v33 = vpack.c.bf16 %v381_v16, %v380_v15 }
  0x5a   : > { %v398_v25 = vld [vmem:[%s3227_s10 + $0x1c0] sm:$0xff]  ;;  %v473_v34 = vpack.c.bf16 %v413_v20, %v412_v19  ;;  %v400_v35 = vld [vmem:[%s3227_s10 + $0x1d0] sm:$0xff]  ;;  %v401_v36 = vld [vmem:[%s3227_s10 + $0x1d8] sm:$0xff]  ;;  %v482_v40 = vpack.c.bf16 %v431_v28, %v430_v27 }
  0x5b   : > { %v414_v31 = vld [vmem:[%s3227_s10 + $0x240] sm:$0xff]  ;;  %v466_v39 = vpack.c.bf16 %v399_v26, %v398_v25  ;;  %v385_v44 = vld [vmem:[%s3227_s10 + $0x158] sm:$0xff]  ;;  %v416_v45 = vld [vmem:[%s3227_s10 + $0x250] sm:$0xff]  ;;  %v467_v52 = vpack.c.bf16 %v401_v36, %v400_v35 }
  0x5c   : > { %2554 = vmatpush3.bf16.msra.mxu0 %v444_v30  ;;  %2825 = vmatpush3.bf16.msra.mxu1 %v444_v30  ;;  %v383_v30 = vld [vmem:[%s3227_s10 + $0x148] sm:$0xff]  ;;  %v2905_v37 = vld [vmem:[%s3229_s11 + $0x60] ss:$24 sps:$4 sm:$0xff]   ;;  %v404_v63 = vld [vmem:[%s3227_s10 + $0x1f0] sm:$0xff] }
  0x5d   : > { %2555 = vmatprep.subr.bf16.mxu0 %v453_v32  ;;  %2818 = vmatprep.subr.bf16.mxu1 %v453_v32  ;;  %v415_v32 = vld [vmem:[%s3227_s10 + $0x248] sm:$0xff]  ;;  %v417_v46 = vld [vmem:[%s3227_s10 + $0x258] sm:$0xff]  ;;  %v458_v47 = vpack.c.bf16 %v383_v30, %v382_v29  ;;  %v402_v51 = vld [vmem:[%s3227_s10 + $0x1e0] sm:$0xff] }
  0x5e   : > { %v474_v48 = vpack.c.bf16 %v415_v32, %v414_v31  ;;  %v2907_v49 = vld [vmem:[%s3229_s11 + $0x94] ss:$24 sps:$4 sm:$0xff]   ;;  %v434_v55 = vld [vmem:[%s3227_s10 + $0x2e0] sm:$0xff]  ;;  %v475_v62 = vpack.c.bf16 %v417_v46, %v416_v45  ;;  %v405_v0 = vld [vmem:[%s3227_s10 + $0x1f8] sm:$0xff] }
  0x5f   : > { %v435_v56 = vld [vmem:[%s3227_s10 + $0x2e8] sm:$0xff]  ;;  %v436_v4 = vld [vmem:[%s3227_s10 + $0x2f0] sm:$0xff]  ;;  %v389_v8 = vld [vmem:[%s3227_s10 + $0x178] sm:$0xff]  ;;  %v469_v12 = vpack.c.bf16 %v405_v0, %v404_v63 }
  0x60   : > { %2556 = vmatpush3.bf16.msra.mxu0 %v445_v38  ;;  %2826 = vmatpush3.bf16.msra.mxu1 %v445_v38  ;;  %v2906_v38 = vld [vmem:[%s3229_s11 + $0x120] ss:$24 sps:$4 sm:$0xff]   ;;  %v484_v3 = vpack.c.bf16 %v435_v56, %v434_v55  ;;  %v420_v11 = vld [vmem:[%s3227_s10 + $0x270] sm:$0xff]  ;;  %v2915_v15 = vld [vmem:[%s3229_s11 + $0xc] ss:$24 sps:$4 sm:$0xff]  }
  0x61   : > { %2605 = vmatprep.subr.bf16.mxu1 %v462_v42  ;;  %2669 = vmatprep.subr.bf16.mxu0 %v478_v43  ;;  %v433_v42 = vld [vmem:[%s3227_s10 + $0x2d8] sm:$0xff]  ;;  %v384_v43 = vld [vmem:[%s3227_s10 + $0x150] sm:$0xff]  ;;  %v2913_v19 = vld [vmem:[%s3229_s11 + $0x8] ss:$24 sps:$4 sm:$0xff]  }
  0x62   : > { %v459_v61 = vpack.c.bf16 %v385_v44, %v384_v43  ;;  %v2918_v16 = vld [vmem:[%s3229_s11 + $0x14] ss:$24 sps:$4 sm:$0xff]   ;;  %v2916_v20 = vld [vmem:[%s3229_s11 + $0x10] ss:$24 sps:$4 sm:$0xff]   ;;  %v2933_v30 = vld [vmem:[%s3229_s11 + $0xa4] ss:$24 sps:$4 sm:$0xff]  }
  0x63   : > { %823 = vmatmul.mubr.bf16.vlgmr.msra.gmra.mrb[0].mxu0 %v2889_v41  ;;  %855 = vmatmul.mubr.bf16.vlgmr.msra.gmra.mrb[0].mxu1 %v2892_v50  ;;  %v432_v41 = vld [vmem:[%s3227_s10 + $0x2d0] sm:$0xff]  ;;  %v2925_v25 = vld [vmem:[%s3229_s11 + $0x6c] ss:$24 sps:$4 sm:$0xff]   ;;  %v2929_v27 = vld [vmem:[%s3229_s11 + $0x68] ss:$24 sps:$4 sm:$0xff]  }
  0x64   : > { %2606 = vmatpush3.bf16.msra.mxu1 %v454_v53  ;;  %2670 = vmatpush3.bf16.msra.mxu0 %v470_v54  ;;  %v2909_v50 = vld [vmem:[%s3229_s11 + $0x154] ss:$24 sps:$4 sm:$0xff]   ;;  %v483_v53 = vpack.c.bf16 %v433_v42, %v432_v41  ;;  %v2930_v28 = vld [vmem:[%s3229_s11 + $0x70] ss:$24 sps:$4 sm:$0xff]   ;;  %v2936_v32 = vld [vmem:[%s3229_s11 + $0xa0] ss:$24 sps:$4 sm:$0xff]  }
  0x65   : > { %2607 = vmatprep.subr.bf16.mxu1 %v463_v58  ;;  %2671 = vmatprep.subr.bf16.mxu0 %v479_v59  ;;  %v403_v54 = vld [vmem:[%s3227_s10 + $0x1e8] sm:$0xff]  ;;  %v418_v59 = vld [vmem:[%s3227_s10 + $0x260] sm:$0xff]  ;;  %v2931_v29 = vld [vmem:[%s3229_s11 + $0x9c] ss:$24 sps:$4 sm:$0xff]  }
  0x66   : > { %830 = vmatprep.mubr.bf16.mxu0 %v2895_v57  ;;  %862 = vmatprep.mubr.bf16.mxu1 %v2897_v60  ;;  %v386_v57 = vld [vmem:[%s3227_s10 + $0x160] sm:$0xff]  ;;  %v387_v58 = vld [vmem:[%s3227_s10 + $0x168] sm:$0xff]  ;;  %v2935_v31 = vld [vmem:[%s3229_s11 + $0x98] ss:$24 sps:$4 sm:$0xff]  }
  0x67   : > { %v419_v60 = vld [vmem:[%s3227_s10 + $0x268] sm:$0xff]  ;;  %v460_v9 = vpack.c.bf16 %v387_v58, %v386_v57  ;;  %v2955_v45 = vld [vmem:[%s3229_s11 + $0x15c] ss:$24 sps:$4 sm:$0xff]  }
  0x68   : > { %2608 = vmatpush3.bf16.msra.mxu1 %v455_v1  ;;  %2672 = vmatpush3.bf16.msra.mxu0 %v471_v2  ;;  %v2911_v1 = vld [vmem:[%s3229_s11 + $0x90] ss:$24 sps:$4 sm:$0xff]   ;;  %v468_v2 = vpack.c.bf16 %v403_v54, %v402_v51  ;;  %v476_v10 = vpack.c.bf16 %v419_v60, %v418_v59  ;;  %v2927_v26 = vld [vmem:[%s3229_s11 + $0x74] ss:$24 sps:$4 sm:$0xff]   ;;  %v2957_v46 = vld [vmem:[%s3229_s11 + $0x164] ss:$24 sps:$4 sm:$0xff]  }
  0x69   : > { %2609 = vmatprep.subr.bf16.mxu1 %v464_v6  ;;  %2673 = vmatprep.subr.bf16.mxu0 %v480_v7  ;;  %v2912_v6 = vld [vmem:[%s3229_s11 + $0x150] ss:$24 sps:$4 sm:$0xff]   ;;  %v2949_v41 = vld [vmem:[%s3229_s11 + $0x12c] ss:$24 sps:$4 sm:$0xff]  }
  0x6a   : > { %v388_v7 = vld [vmem:[%s3227_s10 + $0x170] sm:$0xff]  ;;  %v2941_v35 = vld [vmem:[%s3229_s11 + $0xc8] ss:$24 sps:$4 sm:$0xff]  }
  0x6b   : > { %831 = vmatmul.mubr.bf16.gmra.mrb[4].mxu0 %v2899_v5  ;;  %863 = vmatmul.mubr.bf16.gmra.mrb[4].mxu1 %v2900_v14  ;;  %v437_v5 = vld [vmem:[%s3227_s10 + $0x2f8] sm:$0xff]  ;;  %v2942_v36 = vld [vmem:[%s3229_s11 + $0xd0] ss:$24 sps:$4 sm:$0xff]   ;;  %v2951_v42 = vld [vmem:[%s3229_s11 + $0x134] ss:$24 sps:$4 sm:$0xff]  }
  0x6c   : > { %2610 = vmatpush3.bf16.msra.mxu1 %v456_v17  ;;  %2674 = vmatpush3.bf16.msra.mxu0 %v472_v18  ;;  %v485_v13 = vpack.c.bf16 %v437_v5, %v436_v4  ;;  %v421_v14 = vld [vmem:[%s3227_s10 + $0x278] sm:$0xff]  ;;  %v461_v17 = vpack.c.bf16 %v389_v8, %v388_v7  ;;  %v2953_v43 = vld [vmem:[%s3229_s11 + $0x128] ss:$24 sps:$4 sm:$0xff]  }
  0x6d   : > { %2611 = vmatprep.subr.bf16.mxu1 %v465_v22  ;;  %2675 = vmatprep.subr.bf16.mxu0 %v481_v23  ;;  %v477_v18 = vpack.c.bf16 %v421_v14, %v420_v11  ;;  %v2921_v22 = vld [vmem:[%s3229_s11 + $0x44] ss:$24 sps:$4 sm:$0xff]   ;;  %v2923_v23 = vld [vmem:[%s3229_s11 + $0x38] ss:$24 sps:$4 sm:$0xff]  }
  0x6e   : > { %838 = vmatprep.mubr.bf16.mxu0 %v2901_v21  ;;  %870 = vmatprep.mubr.bf16.mxu1 %v2903_v24  ;;  %v2919_v21 = vld [vmem:[%s3229_s11 + $0x3c] ss:$24 sps:$4 sm:$0xff]   ;;  %v2924_v24 = vld [vmem:[%s3229_s11 + $0x40] ss:$24 sps:$4 sm:$0xff]   ;;  %v2954_v44 = vld [vmem:[%s3229_s11 + $0x130] ss:$24 sps:$4 sm:$0xff]  }
  0x70   : > { %2612 = vmatpush3.bf16.msra.mxu1 %v457_v33  ;;  %2676 = vmatpush3.bf16.msra.mxu0 %v473_v34  ;;  %v2937_v33 = vld [vmem:[%s3229_s11 + $0xcc] ss:$24 sps:$4 sm:$0xff]  }
  0x71   : > { %2613 = vmatprep.subr.bf16.mxu1 %v466_v39  ;;  %2677 = vmatprep.subr.bf16.mxu0 %v482_v40  ;;  %v2939_v34 = vld [vmem:[%s3229_s11 + $0xd4] ss:$24 sps:$4 sm:$0xff]   ;;  %v2947_v39 = vld [vmem:[%s3229_s11 + $0xf8] ss:$24 sps:$4 sm:$0xff]  }
  0x72   : > { %v2948_v40 = vld [vmem:[%s3229_s11 + $0x100] ss:$24 sps:$4 sm:$0xff]  }
  0x73   : > { %839 = vmatmul.mubr.bf16.gmra.mrb[8].mxu0 %v2905_v37  ;;  %871 = vmatmul.mubr.bf16.gmra.mrb[8].mxu1 %v2906_v38  ;;  %v2943_v37 = vld [vmem:[%s3229_s11 + $0xfc] ss:$24 sps:$4 sm:$0xff]  }
  0x74   : > { %2614 = vmatpush3.bf16.msra.mxu1 %v458_v47  ;;  %2678 = vmatpush3.bf16.msra.mxu0 %v474_v48  ;;  %v2945_v38 = vld [vmem:[%s3229_s11 + $0x104] ss:$24 sps:$4 sm:$0xff]   ;;  %v2959_v47 = vld [vmem:[%s3229_s11 + $0x158] ss:$24 sps:$4 sm:$0xff]  }
  0x75   : > { %2615 = vmatprep.subr.bf16.mxu1 %v467_v52  ;;  %2679 = vmatprep.subr.bf16.mxu0 %v483_v53  ;;  %v2960_v48 = vld [vmem:[%s3229_s11 + $0x160] ss:$24 sps:$4 sm:$0xff]  }
  0x76   : > { %846 = vmatprep.mubr.bf16.mxu0 %v2907_v49  ;;  %878 = vmatprep.mubr.bf16.mxu1 %v2909_v50 }
  0x78   : > { %2616 = vmatpush3.bf16.msra.mxu1 %v459_v61  ;;  %2680 = vmatpush3.bf16.msra.mxu0 %v475_v62 }
  0x79   : > { %2617 = vmatprep.subr.bf16.mxu1 %v468_v2  ;;  %2681 = vmatprep.subr.bf16.mxu0 %v484_v3 }
  0x7b   : > { %847 = vmatmul.mubr.bf16.gmra.mrb[12].mxu0 %v2911_v1  ;;  %879 = vmatmul.mubr.bf16.gmra.mrb[12].mxu1 %v2912_v6 }
  0x7c   : > { %2618 = vmatpush3.bf16.msra.mxu1 %v460_v9  ;;  %2682 = vmatpush3.bf16.msra.mxu0 %v476_v10 }
  0x7d   : > { %2619 = vmatprep.subr.bf16.mxu1 %v469_v12  ;;  %2683 = vmatprep.subr.bf16.mxu0 %v485_v13 }
  0x7e   : > { %919 = vmatprep.mubr.bf16.mxu1 %v2915_v15  ;;  %1016 = vmatprep.mubr.bf16.mxu0 %v2918_v16 }
  0x80   : > { %2620 = vmatpush3.bf16.msra.mxu1 %v461_v17  ;;  %2684 = vmatpush3.bf16.msra.mxu0 %v477_v18 }
  0x83   : > { %920 = vmatmul.mubr.bf16.vlgmr.msra.gmra.mrb[16].mxu1 %v2913_v19  ;;  %1017 = vmatmul.mubr.bf16.vlgmr.msra.gmra.mrb[16].mxu0 %v2916_v20 }
  0x84   : > { %927 = vmatprep.mubr.bf16.mxu1 %v2919_v21  ;;  %1024 = vmatprep.mubr.bf16.mxu0 %v2921_v22 }
  0x8b   : > { %928 = vmatmul.mubr.bf16.gmra.mrb[20].mxu1 %v2923_v23  ;;  %1025 = vmatmul.mubr.bf16.gmra.mrb[20].mxu0 %v2924_v24 }
  0x8c   : > { %935 = vmatprep.mubr.bf16.mxu1 %v2925_v25  ;;  %1032 = vmatprep.mubr.bf16.mxu0 %v2927_v26 }
  0x93   : > { %936 = vmatmul.mubr.bf16.gmra.mrb[24].mxu1 %v2929_v27  ;;  %1033 = vmatmul.mubr.bf16.gmra.mrb[24].mxu0 %v2930_v28 }
  0x94   : > { %943 = vmatprep.mubr.bf16.mxu1 %v2931_v29  ;;  %1040 = vmatprep.mubr.bf16.mxu0 %v2933_v30 }
  0x9b   : > { %944 = vmatmul.mubr.bf16.gmra.mrb[28].mxu1 %v2935_v31  ;;  %1041 = vmatmul.mubr.bf16.gmra.mrb[28].mxu0 %v2936_v32 }
  0x9c   : > { %951 = vmatprep.mubr.bf16.mxu1 %v2937_v33  ;;  %1048 = vmatprep.mubr.bf16.mxu0 %v2939_v34 }
  0xa3   : > { %952 = vmatmul.mubr.bf16.gmra.mrb[32].mxu1 %v2941_v35  ;;  %1049 = vmatmul.mubr.bf16.gmra.mrb[32].mxu0 %v2942_v36 }
  0xa4   : > { %959 = vmatprep.mubr.bf16.mxu1 %v2943_v37  ;;  %1056 = vmatprep.mubr.bf16.mxu0 %v2945_v38 }
  0xab   : > { %960 = vmatmul.mubr.bf16.gmra.mrb[36].mxu1 %v2947_v39  ;;  %1057 = vmatmul.mubr.bf16.gmra.mrb[36].mxu0 %v2948_v40 }
  0xac   : > { %967 = vmatprep.mubr.bf16.mxu1 %v2949_v41  ;;  %1064 = vmatprep.mubr.bf16.mxu0 %v2951_v42 }
  0xb3   : > { %968 = vmatmul.mubr.bf16.gmra.mrb[40].mxu1 %v2953_v43  ;;  %1065 = vmatmul.mubr.bf16.gmra.mrb[40].mxu0 %v2954_v44 }
  0xb4   : > { %975 = vmatprep.mubr.bf16.mxu1 %v2955_v45  ;;  %1072 = vmatprep.mubr.bf16.mxu0 %v2957_v46  ;;  %v486_v46 = vld [vmem:[#allocation2] sm:$0xff] }
  0xbb   : > { %976 = vmatmul.mubr.bf16.gmra.mrb[44].mxu1 %v2959_v47  ;;  %1073 = vmatmul.mubr.bf16.gmra.mrb[44].mxu0 %v2960_v48 }
 0x136   : > { %v2557_v49 = vpop.f32.mrb[0].mxu0  ;;  %v2581_v50 = vpop.f32.mrb[0].mxu1 }
 0x137   : > { %v2558_v51 = vpop.f32.mrb[1].mxu0  ;;  %v2582_v52 = vpop.f32.mrb[1].mxu1 }
 0x138   : > { %v2559_v53 = vadd.f32 %v2558_v51, %v2557_v49  ;;  %v3392_v54 = vadd.f32 %v2582_v52, %v2581_v50  ;;  %v2560_v55 = vpop.f32.mrb[2].mxu0  ;;  %v2584_v56 = vpop.f32.mrb[2].mxu1  ;;  %v487_v49 = vld [vmem:[#allocation2 + $0x8] sm:$0xff] }
 0x139   : > { %v2561_v57 = vpop.f32.mrb[3].mxu0  ;;  %v2585_v58 = vpop.f32.mrb[3].mxu1 }
 0x13a   : > { %v2562_v59 = vadd.f32 %v2561_v57, %v2560_v55  ;;  %v3394_v60 = vadd.f32 %v2585_v58, %v2584_v56 }
 0x13e   : > { %v2563_v61 = vpop.f32.mrb[4].mxu0  ;;  %v2587_v62 = vpop.f32.mrb[4].mxu1 }
 0x13f   : > { %v2564_v63 = vpop.f32.mrb[5].mxu0  ;;  %v2588_v0 = vpop.f32.mrb[5].mxu1 }
 0x140   : > { %v3396_v1 = vadd.f32 %v2564_v63, %v2563_v61  ;;  %v3398_v2 = vadd.f32 %v2588_v0, %v2587_v62  ;;  %v2566_v3 = vpop.f32.mrb[6].mxu0  ;;  %v2590_v4 = vpop.f32.mrb[6].mxu1 }
 0x141   : > { %v2567_v5 = vpop.f32.mrb[7].mxu0  ;;  %v2591_v6 = vpop.f32.mrb[7].mxu1 }
 0x142   : > { %v3400_v7 = vadd.f32 %v2567_v5, %v2566_v3  ;;  %v3402_v8 = vadd.f32 %v2591_v6, %v2590_v4  ;;  %v488_v6 = vld [vmem:[#allocation2 + $0x10] sm:$0xff] }
 0x146   : > { %v2569_v9 = vpop.f32.mrb[8].mxu0  ;;  %v2593_v10 = vpop.f32.mrb[8].mxu1 }
 0x147   : > { %v2570_v11 = vpop.f32.mrb[9].mxu0  ;;  %v2594_v12 = vpop.f32.mrb[9].mxu1 }
 0x148   : > { %v3404_v13 = vadd.f32 %v2570_v11, %v2569_v9  ;;  %v3406_v14 = vadd.f32 %v2594_v12, %v2593_v10  ;;  %v2572_v15 = vpop.f32.mrb[10].mxu0  ;;  %v2596_v16 = vpop.f32.mrb[10].mxu1  ;;  %v489_v11 = vld [vmem:[#allocation2 + $0x18] sm:$0xff] }
 0x149   : > { %v2573_v17 = vpop.f32.mrb[11].mxu0  ;;  %v2597_v18 = vpop.f32.mrb[11].mxu1 }
 0x14a   : > { %v3408_v19 = vadd.f32 %v2573_v17, %v2572_v15  ;;  %v3410_v20 = vadd.f32 %v2597_v18, %v2596_v16 }
 0x14e   : > { %v2575_v21 = vpop.f32.mrb[12].mxu0  ;;  %v2599_v22 = vpop.f32.mrb[12].mxu1 }
 0x14f   : > { %v2576_v23 = vpop.f32.mrb[13].mxu0  ;;  %v2600_v24 = vpop.f32.mrb[13].mxu1 }
 0x150   : > { %v3412_v25 = vadd.f32 %v2576_v23, %v2575_v21  ;;  %v3414_v26 = vadd.f32 %v2600_v24, %v2599_v22  ;;  %v2578_v27 = vpop.f32.mrb[14].mxu0  ;;  %v2602_v28 = vpop.f32.mrb[14].mxu1 }
 0x151   : > { %v2579_v29 = vpop.f32.mrb[15].mxu0  ;;  %v2603_v30 = vpop.f32.mrb[15].mxu1 }
 0x152   : > { %v3416_v31 = vadd.f32 %v2579_v29, %v2578_v27  ;;  %v3418_v32 = vadd.f32 %v2603_v30, %v2602_v28 }
 0x156   : > { %v2621_v33 = vpop.f32.mrb[16].mxu1  ;;  %v2685_v34 = vpop.f32.mrb[16].mxu0 }
 0x157   : > { %v2622_v35 = vpop.f32.mrb[17].mxu1  ;;  %v2686_v36 = vpop.f32.mrb[17].mxu0 }
 0x158   : > { %v2623_v37 = vadd.f32 %v2622_v35, %v2621_v33  ;;  %v2687_v38 = vadd.f32 %v2686_v36, %v2685_v34  ;;  %v2624_v39 = vpop.f32.mrb[18].mxu1  ;;  %v2688_v40 = vpop.f32.mrb[18].mxu0  ;;  %v490_v34 = vld [vmem:[#allocation2 + $0x20] sm:$0xff] }
 0x159   : > { %v2625_v41 = vpop.f32.mrb[19].mxu1  ;;  %v2689_v42 = vpop.f32.mrb[19].mxu0 }
 0x15a   : > { %v922_v43 = vadd.f32 %v2623_v37, %v2559_v53  ;;  %v2626_v44 = vadd.f32 %v2625_v41, %v2624_v39  ;;  %v2690_v45 = vadd.f32 %v2689_v42, %v2688_v40  ;;  %v491_v37 = vld [vmem:[#allocation2 + $0x28] sm:$0xff] }
 0x15c   : > { %v1019_v47 = vadd.f32 %v2687_v38, %v922_v43  ;;  %v925_v48 = vadd.f32 %v2626_v44, %v2562_v59 }
 0x15e   : > { %v1081_v50 = vadd.f32 %v1019_v47, %v486_v46  ;;  %v1022_v51 = vadd.f32 %v2690_v45, %v925_v48  ;;  %v2627_v52 = vpop.f32.mrb[20].mxu1  ;;  %v2691_v55 = vpop.f32.mrb[20].mxu0 }
 0x15f   : > { %v2628_v56 = vpop.f32.mrb[21].mxu1  ;;  %v2692_v57 = vpop.f32.mrb[21].mxu0 }
 0x160   : > { %1098 = vst.msk [vmem:[#allocation2] sm:$0xff] %vm1097_vm1, %v1081_v50  ;;  %v1082_v58 = vadd.f32 %v1022_v51, %v487_v49  ;;  %v2629_v61 = vadd.f32 %v2628_v56, %v2627_v52  ;;  %v2693_v62 = vadd.f32 %v2692_v57, %v2691_v55  ;;  %v2630_v63 = vpop.f32.mrb[22].mxu1  ;;  %v2694_v53 = vpop.f32.mrb[22].mxu0  ;;  %v492_v52 = vld [vmem:[#allocation2 + $0x30] sm:$0xff]  ;;  %v493_v57 = vld [vmem:[#allocation2 + $0x38] sm:$0xff] }
 0x161   : > { %v2631_v0 = vpop.f32.mrb[23].mxu1  ;;  %v2695_v3 = vpop.f32.mrb[23].mxu0 }
 0x162   : > { %1099 = vst.msk [vmem:[#allocation2 + $0x8] sm:$0xff] %vm1097_vm1, %v1082_v58  ;;  %v930_v59 = vadd.f32 %v2629_v61, %v3396_v1  ;;  %v2632_v4 = vadd.f32 %v2631_v0, %v2630_v63  ;;  %v2696_v5 = vadd.f32 %v2695_v3, %v2694_v53 }
 0x164   : > { %v1027_v9 = vadd.f32 %v2693_v62, %v930_v59  ;;  %v933_v10 = vadd.f32 %v2632_v4, %v3400_v7 }
 0x166   : > { %v1083_v12 = vadd.f32 %v1027_v9, %v488_v6  ;;  %v1030_v15 = vadd.f32 %v2696_v5, %v933_v10  ;;  %v2633_v16 = vpop.f32.mrb[24].mxu1  ;;  %v2697_v17 = vpop.f32.mrb[24].mxu0 }
 0x167   : > { %v2634_v18 = vpop.f32.mrb[25].mxu1  ;;  %v2698_v21 = vpop.f32.mrb[25].mxu0 }
 0x168   : > { %1100 = vst.msk [vmem:[#allocation2 + $0x10] sm:$0xff] %vm1097_vm1, %v1083_v12  ;;  %v1084_v22 = vadd.f32 %v1030_v15, %v489_v11  ;;  %v2635_v23 = vadd.f32 %v2634_v18, %v2633_v16  ;;  %v2699_v24 = vadd.f32 %v2698_v21, %v2697_v17  ;;  %v2636_v27 = vpop.f32.mrb[26].mxu1  ;;  %v2700_v1 = vpop.f32.mrb[26].mxu0  ;;  %v494_v12 = vld [vmem:[#allocation2 + $0x40] sm:$0xff]  ;;  %v495_v17 = vld [vmem:[#allocation2 + $0x48] sm:$0xff] }
 0x169   : > { %v2637_v28 = vpop.f32.mrb[27].mxu1  ;;  %v2701_v29 = vpop.f32.mrb[27].mxu0 }
 0x16a   : > { %1101 = vst.msk [vmem:[#allocation2 + $0x18] sm:$0xff] %vm1097_vm1, %v1084_v22  ;;  %v938_v7 = vadd.f32 %v2635_v23, %v3404_v13  ;;  %v2638_v30 = vadd.f32 %v2637_v28, %v2636_v27  ;;  %v2702_v33 = vadd.f32 %v2701_v29, %v2700_v1 }
 0x16c   : > { %v1035_v35 = vadd.f32 %v2699_v24, %v938_v7  ;;  %v941_v36 = vadd.f32 %v2638_v30, %v3408_v19 }
 0x16e   : > { %v1085_v38 = vadd.f32 %v1035_v35, %v490_v34  ;;  %v1038_v39 = vadd.f32 %v2702_v33, %v941_v36  ;;  %v2639_v40 = vpop.f32.mrb[28].mxu1  ;;  %v2703_v41 = vpop.f32.mrb[28].mxu0  ;;  %v496_v36 = vld [vmem:[#allocation2 + $0x50] sm:$0xff] }
 0x16f   : > { %v2640_v42 = vpop.f32.mrb[29].mxu1  ;;  %v2704_v43 = vpop.f32.mrb[29].mxu0 }
 0x170   : > { %1102 = vst.msk [vmem:[#allocation2 + $0x20] sm:$0xff] %vm1097_vm1, %v1085_v38  ;;  %v1086_v44 = vadd.f32 %v1038_v39, %v491_v37  ;;  %v2641_v45 = vadd.f32 %v2640_v42, %v2639_v40  ;;  %v2705_v46 = vadd.f32 %v2704_v43, %v2703_v41  ;;  %v2642_v47 = vpop.f32.mrb[30].mxu1  ;;  %v2706_v13 = vpop.f32.mrb[30].mxu0  ;;  %v497_v39 = vld [vmem:[#allocation2 + $0x58] sm:$0xff] }
 0x171   : > { %v2643_v48 = vpop.f32.mrb[31].mxu1  ;;  %v2707_v49 = vpop.f32.mrb[31].mxu0 }
 0x172   : > { %1103 = vst.msk [vmem:[#allocation2 + $0x28] sm:$0xff] %vm1097_vm1, %v1086_v44  ;;  %v946_v19 = vadd.f32 %v2641_v45, %v3412_v25  ;;  %v2644_v50 = vadd.f32 %v2643_v48, %v2642_v47  ;;  %v2708_v51 = vadd.f32 %v2707_v49, %v2706_v13 }
 0x174   : > { %v1043_v55 = vadd.f32 %v2705_v46, %v946_v19  ;;  %v949_v56 = vadd.f32 %v2644_v50, %v3416_v31 }
 0x176   : > { %v1087_v58 = vadd.f32 %v1043_v55, %v492_v52  ;;  %v1046_v61 = vadd.f32 %v2708_v51, %v949_v56  ;;  %v2645_v62 = vpop.f32.mrb[32].mxu1  ;;  %v2709_v63 = vpop.f32.mrb[32].mxu0  ;;  %v498_v52 = vld [vmem:[#allocation2 + $0x60] sm:$0xff] }
 0x177   : > { %v2646_v53 = vpop.f32.mrb[33].mxu1  ;;  %v2710_v0 = vpop.f32.mrb[33].mxu0 }
 0x178   : > { %1104 = vst.msk [vmem:[#allocation2 + $0x30] sm:$0xff] %vm1097_vm1, %v1087_v58  ;;  %v1088_v3 = vadd.f32 %v1046_v61, %v493_v57  ;;  %v2647_v59 = vadd.f32 %v2646_v53, %v2645_v62  ;;  %v2711_v4 = vadd.f32 %v2710_v0, %v2709_v63  ;;  %v2648_v5 = vpop.f32.mrb[34].mxu1  ;;  %v2712_v25 = vpop.f32.mrb[34].mxu0  ;;  %v499_v57 = vld [vmem:[#allocation2 + $0x68] sm:$0xff] }
 0x179   : > { %v2649_v6 = vpop.f32.mrb[35].mxu1  ;;  %v2713_v9 = vpop.f32.mrb[35].mxu0 }
 0x17a   : > { %1105 = vst.msk [vmem:[#allocation2 + $0x38] sm:$0xff] %vm1097_vm1, %v1088_v3  ;;  %v954_v31 = vadd.f32 %v2647_v59, %v3392_v54  ;;  %v2650_v10 = vadd.f32 %v2649_v6, %v2648_v5  ;;  %v2714_v11 = vadd.f32 %v2713_v9, %v2712_v25 }
 0x17c   : > { %v1051_v15 = vadd.f32 %v2711_v4, %v954_v31  ;;  %v957_v16 = vadd.f32 %v2650_v10, %v3394_v60  ;;  %v500_v10 = vld [vmem:[#allocation2 + $0x70] sm:$0xff] }
 0x17e   : > { %v1089_v18 = vadd.f32 %v1051_v15, %v494_v12  ;;  %v1054_v21 = vadd.f32 %v2714_v11, %v957_v16  ;;  %v2651_v22 = vpop.f32.mrb[36].mxu1  ;;  %v2715_v23 = vpop.f32.mrb[36].mxu0  ;;  %v501_v15 = vld [vmem:[#allocation2 + $0x78] sm:$0xff] }
 0x17f   : > { %v2652_v24 = vpop.f32.mrb[37].mxu1  ;;  %v2716_v27 = vpop.f32.mrb[37].mxu0 }
 0x180   : > { %1106 = vst.msk [vmem:[#allocation2 + $0x40] sm:$0xff] %vm1097_vm1, %v1089_v18  ;;  %v1090_v1 = vadd.f32 %v1054_v21, %v495_v17  ;;  %v2653_v28 = vadd.f32 %v2652_v24, %v2651_v22  ;;  %v2717_v29 = vadd.f32 %v2716_v27, %v2715_v23  ;;  %v2654_v7 = vpop.f32.mrb[38].mxu1  ;;  %v2718_v54 = vpop.f32.mrb[38].mxu0  ;;  %v3451_v21 = vld [vmem:[#allocation2] sm:$0xff] (!%p2519_p10)  ;;  %v3455_v22 = vld [vmem:[#allocation2 + $0x8] sm:$0xff] (!%p2519_p10)  ;;  %v3461_v24 = vld [vmem:[#allocation2 + $0x18] sm:$0xff] (!%p2519_p10) }
 0x181   : > { %v2655_v30 = vpop.f32.mrb[39].mxu1  ;;  %v2719_v33 = vpop.f32.mrb[39].mxu0  ;;  %v3463_v27 = vld [vmem:[#allocation2 + $0x20] sm:$0xff] (!%p2519_p10) }
 0x182   : > { %1107 = vst.msk [vmem:[#allocation2 + $0x48] sm:$0xff] %vm1097_vm1, %v1090_v1  ;;  %v962_v60 = vadd.f32 %v2653_v28, %v3398_v2  ;;  %v2656_v34 = vadd.f32 %v2655_v30, %v2654_v7  ;;  %v2720_v35 = vadd.f32 %v2719_v33, %v2718_v54  ;;  %v3465_v1 = vld [vmem:[#allocation2 + $0x28] sm:$0xff] (!%p2519_p10)  ;;  %v3467_v28 = vld [vmem:[#allocation2 + $0x30] sm:$0xff] (!%p2519_p10)  ;;  %v1137_v7 = vsel (!%p2519_p10), %vm1097_vm1, %v3455_v22, 0.0 }
 0x183   : > { %v1143_v54 = vsel (!%p2519_p10), %vm1097_vm1, %v3461_v24, 0.0 }
 0x184   : > { %v1059_v37 = vadd.f32 %v2717_v29, %v962_v60  ;;  %v965_v38 = vadd.f32 %v2656_v34, %v3402_v8  ;;  %v3469_v29 = vld [vmem:[#allocation2 + $0x38] sm:$0xff] (!%p2519_p10)  ;;  %v1146_v60 = vsel (!%p2519_p10), %vm1097_vm1, %v3463_v27, 0.0  ;;  %v1149_v34 = vsel (!%p2519_p10), %vm1097_vm1, %v3465_v1, 0.0 }
 0x186   : > { %v1091_v40 = vadd.f32 %v1059_v37, %v496_v36  ;;  %v1062_v41 = vadd.f32 %v2720_v35, %v965_v38  ;;  %v2657_v42 = vpop.f32.mrb[40].mxu1  ;;  %v2721_v43 = vpop.f32.mrb[40].mxu0  ;;  %v1152_v35 = vsel (!%p2519_p10), %vm1097_vm1, %v3467_v28, 0.0  ;;  %v1155_v36 = vsel (!%p2519_p10), %vm1097_vm1, %v3469_v29, 0.0 }
 0x187   : > { %v2658_v44 = vpop.f32.mrb[41].mxu1  ;;  %v2722_v45 = vpop.f32.mrb[41].mxu0  ;;  %v3475_v30 = vld [vmem:[#allocation2 + $0x40] sm:$0xff] (!%p2519_p10) }
 0x188   : > { %1108 = vst.msk [vmem:[#allocation2 + $0x50] sm:$0xff] %vm1097_vm1, %v1091_v40  ;;  %v1092_v46 = vadd.f32 %v1062_v41, %v497_v39  ;;  %v2659_v47 = vadd.f32 %v2658_v44, %v2657_v42  ;;  %v2723_v13 = vadd.f32 %v2722_v45, %v2721_v43  ;;  %v2660_v48 = vpop.f32.mrb[42].mxu1  ;;  %v2724_v2 = vpop.f32.mrb[42].mxu0  ;;  %v1158_v37 = vsel (!%p2519_p10), %vm1097_vm1, %v3475_v30, 0.0 }
 0x189   : > { %v2661_v49 = vpop.f32.mrb[43].mxu1  ;;  %v2725_v19 = vpop.f32.mrb[43].mxu0  ;;  %v3477_v33 = vld [vmem:[#allocation2 + $0x48] sm:$0xff] (!%p2519_p10) }
 0x18a   : > { %1109 = vst.msk [vmem:[#allocation2 + $0x58] sm:$0xff] %vm1097_vm1, %v1092_v46  ;;  %v970_v8 = vadd.f32 %v2659_v47, %v3406_v14  ;;  %v2662_v50 = vadd.f32 %v2661_v49, %v2660_v48  ;;  %v2726_v51 = vadd.f32 %v2725_v19, %v2724_v2  ;;  %v1161_v38 = vsel (!%p2519_p10), %vm1097_vm1, %v3477_v33, 0.0 }
 0x18c   : > { %v1067_v55 = vadd.f32 %v2723_v13, %v970_v8  ;;  %v973_v56 = vadd.f32 %v2662_v50, %v3410_v20 }
 0x18e   : > { %v1093_v58 = vadd.f32 %v1067_v55, %v498_v52  ;;  %v1070_v61 = vadd.f32 %v2726_v51, %v973_v56  ;;  %v2663_v62 = vpop.f32.mrb[44].mxu1  ;;  %v2727_v63 = vpop.f32.mrb[44].mxu0 }
 0x18f   : > { %v2664_v53 = vpop.f32.mrb[45].mxu1  ;;  %v2728_v0 = vpop.f32.mrb[45].mxu0  ;;  %v3491_v39 = vld [vmem:[#allocation2 + $0x50] sm:$0xff] (!%p2519_p10) }
 0x190   : > { %1110 = vst.msk [vmem:[#allocation2 + $0x60] sm:$0xff] %vm1097_vm1, %v1093_v58  ;;  %v1094_v3 = vadd.f32 %v1070_v61, %v499_v57  ;;  %v2665_v59 = vadd.f32 %v2664_v53, %v2663_v62  ;;  %v2729_v4 = vadd.f32 %v2728_v0, %v2727_v63  ;;  %v2666_v5 = vpop.f32.mrb[46].mxu1  ;;  %v2730_v14 = vpop.f32.mrb[46].mxu0  ;;  %v1164_v41 = vsel (!%p2519_p10), %vm1097_vm1, %v3491_v39, 0.0 }
 0x191   : > { %v2667_v25 = vpop.f32.mrb[47].mxu1  ;;  %v2731_v6 = vpop.f32.mrb[47].mxu0  ;;  %v3493_v40 = vld [vmem:[#allocation2 + $0x58] sm:$0xff] (!%p2519_p10) }
 0x192   : > { %1111 = vst.msk [vmem:[#allocation2 + $0x68] sm:$0xff] %vm1097_vm1, %v1094_v3  ;;  %v978_v20 = vadd.f32 %v2665_v59, %v3414_v26  ;;  %v2668_v9 = vadd.f32 %v2667_v25, %v2666_v5  ;;  %v2732_v31 = vadd.f32 %v2731_v6, %v2730_v14  ;;  %v3453_v26 = vld [vmem:[#allocation2 + $0x10] sm:$0xff] (!%p2519_p10)  ;;  %v1167_v42 = vsel (!%p2519_p10), %vm1097_vm1, %v3493_v40, 0.0 }
 0x193   : > { %v1140_v23 = vsel (!%p2519_p10), %vm1097_vm1, %v3453_v26, 0.0 }
 0x194   : > { %v1075_v11 = vadd.f32 %v2729_v4, %v978_v20  ;;  %v981_v12 = vadd.f32 %v2668_v9, %v3418_v32  ;;  %1117 = sbr.rel (%p2519_p10) target bundleno = 1658 (0x67a), region = 67  ;;  %v1134_v32 = vsel (!%p2519_p10), %vm1097_vm1, %v3451_v21, 0.0  ;;  %1141 = vadd.xlane.f32.xlu1 (!%p2519_p10), %v1140_v23 }
 0x195   : > { %1135 = vadd.xlane.f32.xlu0 (!%p2519_p10), %v1134_v32 }
 0x196   : > { %v1095_v16 = vadd.f32 %v1075_v11, %v500_v10  ;;  %v1078_v17 = vadd.f32 %v2732_v31, %v981_v12 }
 0x197   : > { %v3499_v43 = vld [vmem:[#allocation2 + $0x60] sm:$0xff] (!%p2519_p10) }
 0x198   : > { %1112 = vst.msk [vmem:[#allocation2 + $0x70] sm:$0xff] %vm1097_vm1, %v1095_v16  ;;  %v1096_v18 = vadd.f32 %v1078_v17, %v501_v15  ;;  %1144 = vadd.xlane.f32.xlu1 (!%p2519_p10), %v1143_v54  ;;  %v1170_v45 = vsel (!%p2519_p10), %vm1097_vm1, %v3499_v43, 0.0 }
 0x199   : > { %1138 = vadd.xlane.f32.xlu0 (!%p2519_p10), %v1137_v7  ;;  %v3501_v44 = vld [vmem:[#allocation2 + $0x68] sm:$0xff] (!%p2519_p10) }
 0x19a   : > { %1113 = vst.msk [vmem:[#allocation2 + $0x78] sm:$0xff] %vm1097_vm1, %v1096_v18  ;;  %v1173_v46 = vsel (!%p2519_p10), %vm1097_vm1, %v3501_v44, 0.0 }
 0x19c   : > { %1150 = vadd.xlane.f32.xlu1 %v1149_v34 }
 0x19d   : > { %1147 = vadd.xlane.f32.xlu0 %v1146_v60 }
 0x19f   : > { %v3507_v47 = vld [vmem:[#allocation2 + $0x70] sm:$0xff] }
 0x1a0   : > { %1156 = vadd.xlane.f32.xlu1 %v1155_v36  ;;  %v1176_v48 = vsel %vm1097_vm1, %v3507_v47, 0.0 }
 0x1a1   : > { %1153 = vadd.xlane.f32.xlu0 %v1152_v35  ;;  %v3509_v13 = vld [vmem:[#allocation2 + $0x78] sm:$0xff] }
 0x1a2   : > { %v1179_v2 = vsel %vm1097_vm1, %v3509_v13, 0.0 }
 0x1a4   : > { %1162 = vadd.xlane.f32.xlu1 %v1161_v38 }
 0x1a5   : > { %1159 = vadd.xlane.f32.xlu0 %v1158_v37 }
 0x1a8   : > { %1168 = vadd.xlane.f32.xlu1 %v1167_v42 }
 0x1a9   : > { %1165 = vadd.xlane.f32.xlu0 %v1164_v41 }
 0x1ac   : > { %1174 = vadd.xlane.f32.xlu1 %v1173_v46 }
 0x1ad   : > { %1171 = vadd.xlane.f32.xlu0 %v1170_v45 }
 0x1b0   : > { %1180 = vadd.xlane.f32.xlu1 %v1179_v2 }
 0x1b1   : > { %1177 = vadd.xlane.f32.xlu0 %v1176_v48 }
 0x221   : > { %v1142_v19 = vpop.xlane.xlu1 %1141 }
 0x222   : > { %v1136_v49 = vpop.xlane.xlu0 %1135  ;;  %v3517_v50 = vmul.f32 0.020408163, %v1142_v19 }
 0x223   : > { %v3515_v8 = vmul.f32 0.020408163, %v1136_v49 }
 0x224   : > { %v1201_v52 = vsub.f32 %v3453_v26, %v3517_v50 }
 0x225   : > { %v1199_v51 = vsub.f32 %v3451_v21, %v3515_v8  ;;  %v1145_v56 = vpop.xlane.xlu1 %1144 }
 0x226   : > { %v1139_v55 = vpop.xlane.xlu0 %1138  ;;  %v3525_v58 = vmul.f32 0.020408163, %v1145_v56  ;;  %v1217_v62 = vmul.f32 %v1201_v52, %v1201_v52 }
 0x227   : > { %v3523_v57 = vmul.f32 0.020408163, %v1139_v55  ;;  %v1215_v61 = vmul.f32 %v1199_v51, %v1199_v51 }
 0x228   : > { %v1202_v0 = vsub.f32 %v3461_v24, %v3525_v58  ;;  %v1237_v4 = vsel %vm1097_vm1, %v1217_v62, 0.0 }
 0x229   : > { %v1231_v63 = vsel %vm1097_vm1, %v1215_v61, 0.0  ;;  %v1200_v53 = vsub.f32 %v3455_v22, %v3523_v57  ;;  %v1151_v59 = vpop.xlane.xlu1 %1150 }
 0x22a   : > { %1232 = vadd.xlane.f32.xlu0 %v1231_v63  ;;  %v1148_v3 = vpop.xlane.xlu0 %1147  ;;  %v3535_v14 = vmul.f32 0.020408163, %v1151_v59  ;;  %v1218_v6 = vmul.f32 %v1202_v0, %v1202_v0 }
 0x22b   : > { %v3533_v5 = vmul.f32 0.020408163, %v1148_v3  ;;  %v1216_v25 = vmul.f32 %v1200_v53, %v1200_v53 }
 0x22c   : > { %v1204_v31 = vsub.f32 %v3465_v1, %v3535_v14  ;;  %v1240_v12 = vsel %vm1097_vm1, %v1218_v6, 0.0 }
 0x22d   : > { %v1234_v20 = vsel %vm1097_vm1, %v1216_v25, 0.0  ;;  %v1203_v9 = vsub.f32 %v3463_v27, %v3533_v5  ;;  %v1157_v11 = vpop.xlane.xlu1 %1156 }
 0x22e   : > { %1238 = vadd.xlane.f32.xlu0 %v1237_v4  ;;  %1235 = vadd.xlane.f32.xlu1 %v1234_v20  ;;  %v1154_v10 = vpop.xlane.xlu0 %1153  ;;  %v3545_v16 = vmul.f32 0.020408163, %v1157_v11  ;;  %v1220_v18 = vmul.f32 %v1204_v31, %v1204_v31 }
 0x22f   : > { %v3543_v15 = vmul.f32 0.020408163, %v1154_v10  ;;  %v1219_v17 = vmul.f32 %v1203_v9, %v1203_v9 }
 0x230   : > { %v1206_v7 = vsub.f32 %v3469_v29, %v3545_v16  ;;  %v1246_v34 = vsel %vm1097_vm1, %v1220_v18, 0.0 }
 0x231   : > { %v1243_v32 = vsel %vm1097_vm1, %v1219_v17, 0.0  ;;  %v1205_v23 = vsub.f32 %v3467_v28, %v3543_v15  ;;  %v1163_v60 = vpop.xlane.xlu1 %1162 }
 0x232   : > { %1241 = vadd.xlane.f32.xlu1 %v1240_v12  ;;  %1244 = vadd.xlane.f32.xlu0 %v1243_v32  ;;  %v1160_v54 = vpop.xlane.xlu0 %1159  ;;  %v3555_v36 = vmul.f32 0.020408163, %v1163_v60  ;;  %v1222_v38 = vmul.f32 %v1206_v7, %v1206_v7 }
 0x233   : > { %v3553_v35 = vmul.f32 0.020408163, %v1160_v54  ;;  %v1221_v37 = vmul.f32 %v1205_v23, %v1205_v23 }
 0x234   : > { %v1208_v45 = vsub.f32 %v3477_v33, %v3555_v36  ;;  %v1252_v2 = vsel %vm1097_vm1, %v1222_v38, 0.0 }
 0x235   : > { %v1249_v41 = vsel %vm1097_vm1, %v1221_v37, 0.0  ;;  %v1207_v42 = vsub.f32 %v3475_v30, %v3553_v35  ;;  %v1169_v48 = vpop.xlane.xlu1 %1168 }
 0x236   : > { %1247 = vadd.xlane.f32.xlu1 %v1246_v34  ;;  %1250 = vadd.xlane.f32.xlu0 %v1249_v41  ;;  %v1166_v46 = vpop.xlane.xlu0 %1165  ;;  %v3565_v19 = vmul.f32 0.020408163, %v1169_v48  ;;  %v1224_v52 = vmul.f32 %v1208_v45, %v1208_v45  ;;  %v4058_v41 = vmov 0  }
 0x237   : > { %v3563_v49 = vmul.f32 0.020408163, %v1166_v46  ;;  %v1223_v51 = vmul.f32 %v1207_v42, %v1207_v42  ;;  %2961 = vset.pattern.permute.xlu0 %v4058_v41  ;;  %2962 = vset.pattern.permute.xlu1 %v4058_v41 }
 0x238   : > { %v1210_v61 = vsub.f32 %v3493_v40, %v3565_v19  ;;  %v1258_v53 = vsel %vm1097_vm1, %v1224_v52, 0.0 }
 0x239   : > { %v1255_v55 = vsel %vm1097_vm1, %v1223_v51, 0.0  ;;  %v1209_v56 = vsub.f32 %v3491_v39, %v3563_v49  ;;  %v1175_v63 = vpop.xlane.xlu1 %1174 }
 0x23a   : > { %1253 = vadd.xlane.f32.xlu1 %v1252_v2  ;;  %1256 = vadd.xlane.f32.xlu0 %v1255_v55  ;;  %v1172_v62 = vpop.xlane.xlu0 %1171  ;;  %v3575_v3 = vmul.f32 0.020408163, %v1175_v63  ;;  %v1226_v4 = vmul.f32 %v1210_v61, %v1210_v61 }
 0x23b   : > { %v3573_v0 = vmul.f32 0.020408163, %v1172_v62  ;;  %v1225_v59 = vmul.f32 %v1209_v56, %v1209_v56 }
 0x23c   : > { %v1212_v20 = vsub.f32 %v3501_v44, %v3575_v3  ;;  %v1264_v10 = vsel %vm1097_vm1, %v1226_v4, 0.0 }
 0x23d   : > { %v1261_v25 = vsel %vm1097_vm1, %v1225_v59, 0.0  ;;  %v1211_v6 = vsub.f32 %v3499_v43, %v3573_v0  ;;  %v1181_v31 = vpop.xlane.xlu1 %1180 }
 0x23e   : > { %1259 = vadd.xlane.f32.xlu1 %v1258_v53  ;;  %1262 = vadd.xlane.f32.xlu0 %v1261_v25  ;;  %v1178_v9 = vpop.xlane.xlu0 %1177  ;;  %v3585_v12 = vmul.f32 0.020408163, %v1181_v31  ;;  %v1228_v18 = vmul.f32 %v1212_v20, %v1212_v20 }
 0x23f   : > { %v3583_v11 = vmul.f32 0.020408163, %v1178_v9  ;;  %v1227_v17 = vmul.f32 %v1211_v6, %v1211_v6  ;;  %v3600_v9 = vld [vmem:[%s4055_s2] sm:$0xff] }
 0x240   : > { %v1214_v7 = vsub.f32 %v3509_v13, %v3585_v12  ;;  %v1270_v54 = vsel %vm1097_vm1, %v1228_v18, 0.0 }
 0x241   : > { %v1267_v32 = vsel %vm1097_vm1, %v1227_v17, 0.0  ;;  %v1213_v23 = vsub.f32 %v3507_v47, %v3583_v11 }
 0x242   : > { %1265 = vadd.xlane.f32.xlu1 %v1264_v10  ;;  %1268 = vadd.xlane.f32.xlu0 %v1267_v32  ;;  %v1230_v34 = vmul.f32 %v1214_v7, %v1214_v7 }
 0x243   : > { %v1229_v60 = vmul.f32 %v1213_v23, %v1213_v23 }
 0x244   : > { %v1276_v38 = vsel %vm1097_vm1, %v1230_v34, 0.0 }
 0x245   : > { %v1273_v37 = vsel %vm1097_vm1, %v1229_v60, 0.0 }
 0x246   : > { %1271 = vadd.xlane.f32.xlu1 %v1270_v54  ;;  %1274 = vadd.xlane.f32.xlu0 %v1273_v37  ;;  %v3608_v54 = vld [vmem:[%s4055_s2 + $0x8] sm:$0xff] }
 0x24a   : > { %1277 = vadd.xlane.f32.xlu1 %v1276_v38 }
 0x2b7   : > { %v1233_v42 = vpop.xlane.xlu0 %1232 }
 0x2b8   : > { %v1279_v45 = vmul.f32 0.020408163, %v1233_v42 }
 0x2ba   : > { %v1311_v46 = vadd.f32 1e-05, %v1279_v45 }
 0x2bb   : > { %v1236_v48 = vpop.xlane.xlu1 %1235  ;;  %v1239_v2 = vpop.xlane.xlu0 %1238 }
 0x2bc   : > { %2983 = vrsqrt.f32 %v1311_v46  ;;  %v1280_v51 = vmul.f32 0.020408163, %v1236_v48  ;;  %v1281_v52 = vmul.f32 0.020408163, %v1239_v2  ;;  %v3617_v2 = vld [vmem:[%s4055_s2 + $0x10] sm:$0xff] }
 0x2be   : > { %v1312_v55 = vadd.f32 1e-05, %v1280_v51  ;;  %v1313_v56 = vadd.f32 1e-05, %v1281_v52  ;;  %v3623_v51 = vld [vmem:[%s4055_s2 + $0x20] sm:$0xff] }
 0x2bf   : > { %v1242_v61 = vpop.xlane.xlu1 %1241  ;;  %v1245_v62 = vpop.xlane.xlu0 %1244 }
 0x2c0   : > { %2985 = vrsqrt.f32 %v1312_v55  ;;  %v1282_v63 = vmul.f32 0.020408163, %v1242_v61  ;;  %v1283_v53 = vmul.f32 0.020408163, %v1245_v62 }
 0x2c1   : > { %2987 = vrsqrt.f32 %v1313_v56 }
 0x2c2   : > { %v1314_v59 = vadd.f32 1e-05, %v1282_v63  ;;  %v1315_v4 = vadd.f32 1e-05, %v1283_v53 }
 0x2c3   : > { %v1248_v25 = vpop.xlane.xlu1 %1247  ;;  %v1251_v6 = vpop.xlane.xlu0 %1250 }
 0x2c4   : > { %v1284_v20 = vmul.f32 0.020408163, %v1248_v25  ;;  %2989 = vrsqrt.f32 %v1315_v4  ;;  %v1285_v17 = vmul.f32 0.020408163, %v1251_v6 }
 0x2c5   : > { %2991 = vrsqrt.f32 %v1314_v59  ;;  %v3631_v59 = vld [vmem:[%s4055_s2 + $0x18] sm:$0xff] }
 0x2c6   : > { %v2984_v31 = vpop.eup %2983  ;;  %v1316_v10 = vadd.f32 1e-05, %v1284_v20  ;;  %v1317_v34 = vadd.f32 1e-05, %v1285_v17 }
 0x2c7   : > { %v1254_v18 = vpop.xlane.xlu1 %1253  ;;  %v1257_v32 = vpop.xlane.xlu0 %1256  ;;  %v3603_v23 = vmul.f32 %v2984_v31, %v3600_v9 }
 0x2c8   : > { %v1287_v7 = vmul.f32 0.020408163, %v1257_v32  ;;  %2993 = vrsqrt.f32 %v1316_v10  ;;  %v1286_v37 = vmul.f32 0.020408163, %v1254_v18  ;;  %v3641_v18 = vld [vmem:[%s4055_s2 + $0x28] sm:$0xff]  ;;  %v3647_v32 = vld [vmem:[%s4055_s2 + $0x40] sm:$0xff] }
 0x2c9   : > { %1457 = vperm.xlu0 %2961, %v3603_v23  }
 0x2ca   : > { %v2986_v60 = vpop.eup %2985  ;;  %v1319_v38 = vadd.f32 1e-05, %v1287_v7  ;;  %v1318_v52 = vadd.f32 1e-05, %v1286_v37 }
 0x2cb   : > { %v1260_v42 = vpop.xlane.xlu1 %1259  ;;  %v1263_v45 = vpop.xlane.xlu0 %1262  ;;  %v3612_v46 = vmul.f32 %v2986_v60, %v3608_v54 }
 0x2cc   : > { %v2988_v48 = vpop.eup %2987  ;;  %2995 = vrsqrt.f32 %v1319_v38  ;;  %v1288_v55 = vmul.f32 0.020408163, %v1260_v42  ;;  %v1289_v20 = vmul.f32 0.020408163, %v1263_v45  ;;  %v3655_v45 = vld [vmem:[%s4055_s2 + $0x30] sm:$0xff] }
 0x2cd   : > { %1462 = vperm.xlu1 %2962, %v3612_v46   ;;  %2997 = vrsqrt.f32 %v1317_v34  ;;  %v3626_v62 = vmul.f32 %v2988_v48, %v3617_v2 }
 0x2ce   : > { %v2990_v56 = vpop.eup %2989  ;;  %2999 = vrsqrt.f32 %v1318_v52  ;;  %v1320_v6 = vadd.f32 1e-05, %v1288_v55  ;;  %v1321_v7 = vadd.f32 1e-05, %v1289_v20 }
 0x2cf   : > { %v1269_v61 = vpop.xlane.xlu0 %1268  ;;  %v2992_v63 = vpop.eup %2991  ;;  %v1347_v4 = vmul.f32 %v2990_v56, %v3623_v51 }
 0x2d0   : > { %v1291_v53 = vmul.f32 0.020408163, %v1269_v61  ;;  %v1266_v25 = vpop.xlane.xlu1 %1265  ;;  %v3636_v10 = vmul.f32 %v2992_v63, %v3631_v59 }
 0x2d1   : > { %1467 = vperm.xlu1 %2962, %v3626_v62   ;;  %1477 = vperm.xlu0 %2961, %v1347_v4   ;;  %v1290_v60 = vmul.f32 0.020408163, %v1266_v25  ;;  %v3668_v25 = vld [vmem:[%s4055_s2 + $0x60] sm:$0xff] }
 0x2d2   : > { %v1323_v31 = vadd.f32 1e-05, %v1291_v53  ;;  %v2994_v17 = vpop.eup %2993  ;;  %v3663_v53 = vld [vmem:[%s4055_s2 + $0x38] sm:$0xff] }
 0x2d3   : > { %v3650_v38 = vmul.f32 %v2994_v17, %v3641_v18  ;;  %v1322_v52 = vadd.f32 1e-05, %v1290_v60  ;;  %v1275_v56 = vpop.xlane.xlu0 %1274 }
 0x2d4   : > { %3001 = vrsqrt.f32 %v1323_v31  ;;  %v1272_v37 = vpop.xlane.xlu1 %1271  ;;  %v1293_v20 = vmul.f32 0.020408163, %v1275_v56  ;;  %v1359_v56 = vmul.f32 %v3603_v23, %v3515_v8  ;;  %v3691_v8 = vld [vmem:[%s4055_s2 + $0x58] sm:$0xff] }
 0x2d5   : > { %1472 = vperm.xlu1 %2962, %v3636_v10   ;;  %3003 = vrsqrt.f32 %v1320_v6  ;;  %v1292_v55 = vmul.f32 0.020408163, %v1272_v37  ;;  %v3675_v37 = vld [vmem:[%s4055_s2 + $0x48] sm:$0xff] }
 0x2d6   : > { %v2996_v34 = vpop.eup %2995  ;;  %3005 = vrsqrt.f32 %v1321_v7 }
 0x2d7   : > { %v2998_v42 = vpop.eup %2997  ;;  %v1351_v48 = vmul.f32 %v2996_v34, %v3647_v32  ;;  %3007 = vrsqrt.f32 %v1322_v52  ;;  %v1324_v6 = vadd.f32 1e-05, %v1292_v55 }
 0x2d8   : > { %v1349_v61 = vmul.f32 %v2998_v42, %v3655_v45  ;;  %v3000_v63 = vpop.eup %2999  ;;  %v1278_v17 = vpop.xlane.xlu1 %1277  ;;  %v1325_v42 = vadd.f32 1e-05, %v1293_v20  ;;  %v3042_v20 = vmov 1  }
 0x2d9   : > { %1482 = vperm.xlu1 %2962, %v3650_v38   ;;  %1497 = vperm.xlu0 %2961, %v1351_v48   ;;  %v1350_v7 = vmul.f32 %v3000_v63, %v3663_v53  ;;  %3009 = vrsqrt.f32 %v1324_v6  ;;  %v1294_v41 = vmul.f32 0.020408163, %v1278_v17  ;;  %v3683_v63 = vld [vmem:[%s4055_s2 + $0x50] sm:$0xff] }
 0x2da   : > { %3011 = vrsqrt.f32 %v1325_v42  ;;  %v1365_v42 = vmul.f32 %v1349_v61, %v3543_v15 }
 0x2dd   : > { %1487 = vperm.xlu1 %2962, %v1349_v61  }
 0x2de   : > { %v3002_v31 = vpop.eup %3001 }
 0x2df   : > { %v3004_v60 = vpop.eup %3003  ;;  %v1355_v34 = vmul.f32 %v3002_v31, %v3668_v25  ;;  %v1326_v31 = vadd.f32 1e-05, %v1294_v41 }
 0x2e0   : > { %v1352_v52 = vmul.f32 %v3004_v60, %v3675_v37  ;;  %v3006_v55 = vpop.eup %3005  ;;  %v1363_v60 = vmul.f32 %v1347_v4, %v3533_v5 }
 0x2e1   : > { %1492 = vperm.xlu1 %2962, %v1350_v7   ;;  %1517 = vperm.xlu0 %2961, %v1355_v34   ;;  %v1353_v6 = vmul.f32 %v3006_v55, %v3683_v63  ;;  %v3008_v17 = vpop.eup %3007  ;;  %3013 = vrsqrt.f32 %v1326_v31  ;;  %v3699_v55 = vld [vmem:[%s4055_s2 + $0x68] sm:$0xff]  ;;  %v3707_v31 = vld [vmem:[%s4055_s2 + $0x70] sm:$0xff] }
 0x2e2   : > { %v1354_v41 = vmul.f32 %v3008_v17, %v3691_v8 }
 0x2e3   : > { %v3010_v23 = vpop.eup %3009  ;;  %v1369_v17 = vmul.f32 %v1353_v6, %v3563_v49 }
 0x2e4   : > { %v1356_v5 = vmul.f32 %v3010_v23, %v3699_v55  ;;  %v3012_v4 = vpop.eup %3011  ;;  %v1360_v23 = vmul.f32 %v3612_v46, %v3523_v57  ;;  %v1364_v57 = vmul.f32 %v3650_v38, %v3535_v14  ;;  %v1368_v46 = vmul.f32 %v1352_v52, %v3555_v36 }
 0x2e5   : > { %1502 = vperm.xlu1 %2962, %v1352_v52   ;;  %1391 = vrot.lane.b32.xlu0 %v1359_v56, %s3041_s13  ;;  %v1367_v56 = vmul.f32 %v1351_v48, %v3553_v35  ;;  %v1357_v15 = vmul.f32 %v3012_v4, %v3707_v31  ;;  %v1371_v48 = vmul.f32 %v1355_v34, %v3573_v0 }
 0x2e6   : > { %2964 = vset.pattern.permute.xlu0 %v3042_v20  ;;  %v1362_v0 = vmul.f32 %v3636_v10, %v3525_v58  ;;  %v1372_v58 = vmul.f32 %v1356_v5, %v3575_v3 }
 0x2e7   : > { %v1373_v49 = vmul.f32 %v1357_v15, %v3583_v11  ;;  %v1366_v11 = vmul.f32 %v1350_v7, %v3545_v16 }
 0x2e9   : > { %1507 = vperm.xlu1 %2962, %v1353_v6   ;;  %1399 = vrot.lane.b32.xlu0 %v1363_v60, %s3041_s13  ;;  %v3715_v60 = vld [vmem:[%s4055_s2 + $0x78] sm:$0xff]  ;;  %v1361_v6 = vmul.f32 %v3626_v62, %v3517_v50  ;;  %v1370_v50 = vmul.f32 %v1354_v41, %v3565_v19 }
 0x2eb   : > { %v3014_v61 = vpop.eup %3013 }
 0x2ec   : > { %v1358_v35 = vmul.f32 %v3014_v61, %v3715_v60 }
 0x2ed   : > { %1512 = vperm.xlu1 %2962, %v1354_v41   ;;  %1403 = vrot.lane.b32.xlu0 %v1365_v42, %s3041_s13 }
 0x2ee   : > { %v1374_v14 = vmul.f32 %v1358_v35, %v3585_v12 }
 0x2f1   : > { %1522 = vperm.xlu1 %2962, %v1356_v5   ;;  %1407 = vrot.lane.b32.xlu0 %v1367_v56, %s3041_s13 }
 0x2f5   : > { %1527 = vperm.xlu1 %2962, %v1357_v15   ;;  %1411 = vrot.lane.b32.xlu0 %v1369_v17, %s3041_s13 }
 0x2f9   : > { %1532 = vperm.xlu1 %2962, %v1358_v35   ;;  %1415 = vrot.lane.b32.xlu0 %v1371_v48, %s3041_s13 }
 0x2fd   : > { %1393 = vrot.lane.b32.xlu1 %v1360_v23, %s3041_s13  ;;  %1419 = vrot.lane.b32.xlu0 %v1373_v49, %s3041_s13 }
 0x2fe   : > { %2963 = vset.pattern.permute.xlu1 %v3042_v20 }
 0x301   : > { %1395 = vrot.lane.b32.xlu1 %v1361_v6, %s3041_s13 }
 0x305   : > { %1397 = vrot.lane.b32.xlu1 %v1362_v0, %s3041_s13 }
 0x309   : > { %1401 = vrot.lane.b32.xlu1 %v1364_v57, %s3041_s13 }
 0x30d   : > { %1405 = vrot.lane.b32.xlu1 %v1366_v11, %s3041_s13 }
 0x311   : > { %1409 = vrot.lane.b32.xlu1 %v1368_v46, %s3041_s13 }
 0x315   : > { %1413 = vrot.lane.b32.xlu1 %v1370_v50, %s3041_s13 }
 0x319   : > { %1417 = vrot.lane.b32.xlu1 %v1372_v58, %s3041_s13 }
 0x31d   : > { %1421 = vrot.lane.b32.xlu1 %v1374_v14, %s3041_s13 }
 0x348   : > { %v3749_v10 = vpop.permute.xlu0 %1457 }
 0x34c   : > { %v3745_v62 = vpop.permute.xlu1 %1462 }
 0x350   : > { %v3747_v16 = vpop.permute.xlu1 %1467  ;;  %v3753_v38 = vpop.permute.xlu0 %1477 }
 0x354   : > { %v3751_v36 = vpop.permute.xlu1 %1472 }
 0x358   : > { %v3755_v19 = vpop.permute.xlu1 %1482  ;;  %v3757_v7 = vpop.permute.xlu0 %1497 }
 0x35c   : > { %v3759_v3 = vpop.permute.xlu1 %1487 }
 0x360   : > { %v3761_v34 = vpop.permute.xlu1 %1492  ;;  %v3763_v12 = vpop.permute.xlu0 %1517 }
 0x364   : > { %v3765_v52 = vpop.permute.xlu1 %1502  ;;  %v1392_v20 = vpop.permute.xlu0 %1391 }
 0x365   : > { %v1439_v41 = vsub.f32 %v3600_v9, %v1392_v20 }
 0x367   : > { %1553 = vperm.xlu1 %2963, %v1439_v41  }
 0x368   : > { %v3768_v42 = vpop.permute.xlu1 %1507  ;;  %v1400_v61 = vpop.permute.xlu0 %1399 }
 0x369   : > { %v1443_v11 = vsub.f32 %v3623_v51, %v1400_v61 }
 0x36c   : > { %v3770_v5 = vpop.permute.xlu1 %1512  ;;  %v1404_v9 = vpop.permute.xlu0 %1403 }
 0x370   : > { %v3772_v4 = vpop.permute.xlu1 %1522  ;;  %v1408_v0 = vpop.permute.xlu0 %1407 }
 0x374   : > { %v3774_v56 = vpop.permute.xlu1 %1527 }
 0x378   : > { %v3776_v15 = vpop.permute.xlu1 %1532 }
 0x37c   : > { %v1394_v17 = vpop.permute.xlu1 %1393 }
 0x37d   : > { %v1440_v35 = vsub.f32 %v3608_v54, %v1394_v17  ;;  %v1445_v54 = vsub.f32 %v3655_v45, %v1404_v9 }
 0x37f   : > { %1558 = vperm.xlu0 %2964, %v1440_v35  }
 0x380   : > { %v1396_v48 = vpop.permute.xlu1 %1395 }
 0x381   : > { %v1441_v23 = vsub.f32 %v3617_v2, %v1396_v48  ;;  %v1412_v2 = vpop.permute.xlu0 %1411 }
 0x383   : > { %1563 = vperm.xlu0 %2964, %v1441_v23  }
 0x384   : > { %v1398_v49 = vpop.permute.xlu1 %1397 }
 0x385   : > { %v1442_v6 = vsub.f32 %v3631_v59, %v1398_v49  ;;  %v1447_v59 = vsub.f32 %v3647_v32, %v1408_v0  ;;  %v1416_v51 = vpop.permute.xlu0 %1415  ;;  %v1537_v0 = vmul.f32 %v3747_v16, %v3453_v26 }
 0x387   : > { %1568 = vperm.xlu1 %2963, %v1442_v6  }
 0x388   : > { %v1402_v57 = vpop.permute.xlu1 %1401 }
 0x389   : > { %v1444_v46 = vsub.f32 %v3641_v18, %v1402_v57  ;;  %v1449_v18 = vsub.f32 %v3683_v63, %v1412_v2  ;;  %v1420_v35 = vpop.permute.xlu0 %1419  ;;  %v4060_v63 = vmov 0  }
 0x38a   : > { %1672 = vst.msk [vmem:[#allocation3] sm:$0xff] %vm1671_vm2, %v4060_v63  ;;  %1673 = vst.msk [vmem:[#allocation3 + $0x8] sm:$0xff] %vm1671_vm2, %v4060_v63 }
 0x38b   : > { %1578 = vperm.xlu0 %2964, %v1444_v46   ;;  %1573 = vperm.xlu1 %2963, %v1443_v11   ;;  %1674 = vst.msk [vmem:[#allocation3 + $0x10] sm:$0xff] %vm1671_vm2, %v4060_v63  ;;  %1675 = vst.msk [vmem:[#allocation3 + $0x18] sm:$0xff] %vm1671_vm2, %v4060_v63  ;;  %v1538_v11 = vmul.f32 %v3751_v36, %v3461_v24  ;;  %v1540_v36 = vmul.f32 %v3755_v19, %v3465_v1 }
 0x38c   : > { %v1406_v50 = vpop.permute.xlu1 %1405  ;;  %1676 = vst.msk [vmem:[#allocation3 + $0x20] sm:$0xff] %vm1671_vm2, %v4060_v63  ;;  %1677 = vst.msk [vmem:[#allocation3 + $0x28] sm:$0xff] %vm1671_vm2, %v4060_v63  ;;  %v1541_v19 = vmul.f32 %v3759_v3, %v3467_v28 }
 0x38d   : > { %v1446_v58 = vsub.f32 %v3663_v53, %v1406_v50  ;;  %v1451_v53 = vsub.f32 %v3668_v25, %v1416_v51  ;;  %1678 = vst.msk [vmem:[#allocation3 + $0x30] sm:$0xff] %vm1671_vm2, %v4060_v63  ;;  %1679 = vst.msk [vmem:[#allocation3 + $0x38] sm:$0xff] %vm1671_vm2, %v4060_v63  ;;  %v1539_v50 = vmul.f32 %v3753_v38, %v3463_v27 }
 0x38f   : > { %1588 = vperm.xlu1 %2963, %v1446_v58   ;;  %1583 = vperm.xlu0 %2964, %v1445_v54  }
 0x390   : > { %v1410_v14 = vpop.permute.xlu1 %1409 }
 0x391   : > { %v1448_v20 = vsub.f32 %v3675_v37, %v1410_v14  ;;  %v1453_v37 = vsub.f32 %v3707_v31, %v1420_v35 }
 0x393   : > { %1598 = vperm.xlu0 %2964, %v1448_v20   ;;  %1593 = vperm.xlu1 %2963, %v1447_v59   ;;  %v1542_v59 = vmul.f32 %v3761_v34, %v3469_v29  ;;  %v1543_v29 = vmul.f32 %v3757_v7, %v3475_v30  ;;  %v1544_v34 = vmul.f32 %v3765_v52, %v3477_v33 }
 0x394   : > { %v1414_v41 = vpop.permute.xlu1 %1413  ;;  %v1545_v52 = vmul.f32 %v3768_v42, %v3491_v39 }
 0x395   : > { %v1450_v61 = vsub.f32 %v3691_v8, %v1414_v41  ;;  %v1535_v8 = vmul.f32 %v3749_v10, %v3451_v21 }
 0x397   : > { %1608 = vperm.xlu1 %2963, %v1450_v61   ;;  %1603 = vperm.xlu0 %2964, %v1449_v18  }
 0x398   : > { %v1418_v45 = vpop.permute.xlu1 %1417 }
 0x399   : > { %v1452_v17 = vsub.f32 %v3699_v55, %v1418_v45  ;;  %v1536_v55 = vmul.f32 %v3745_v62, %v3455_v22 }
 0x39b   : > { %1618 = vperm.xlu0 %2964, %v1452_v17   ;;  %1613 = vperm.xlu1 %2963, %v1451_v53  }
 0x39c   : > { %v1422_v32 = vpop.permute.xlu1 %1421 }
 0x39d   : > { %v1454_v48 = vsub.f32 %v3715_v60, %v1422_v32  ;;  %v1546_v32 = vmul.f32 %v3770_v5, %v3493_v40  ;;  %v1547_v40 = vmul.f32 %v3763_v12, %v3499_v43  ;;  %v1548_v5 = vmul.f32 %v3772_v4, %v3501_v44 }
 0x39e   : > { %v1549_v4 = vmul.f32 %v3774_v56, %v3507_v47  ;;  %v2966_v56 = vld [vmem:[%s4056_s3 + $0x50] sm:$0xff]  }
 0x39f   : > { %1628 = vperm.xlu1 %2963, %v1454_v48   ;;  %1623 = vperm.xlu0 %2964, %v1453_v37  }
 0x3a0   : > { %2795 = vmatprep.mubr.bf16.mxu1 %v2966_v56 }
 0x3e6   : > { %v1554_v25 = vpop.permute.xlu1 %1553 }
 0x3e7   : > { %v1631_v31 = vadd.f32 %v1554_v25, %v1535_v8 }
 0x3e9   : > { %v1647_v9 = vmax.f32 %v1631_v31, 0.0 }
 0x3fe   : > { %v1559_v60 = vpop.permute.xlu0 %1558 }
 0x3ff   : > { %v1632_v23 = vadd.f32 %v1559_v60, %v1536_v55 }
 0x401   : > { %v1648_v49 = vmax.f32 %v1632_v23, 0.0 }
 0x402   : > { %v1564_v6 = vpop.permute.xlu0 %1563 }
 0x403   : > { %v1663_v57 = vpack.c.bf16 %v1648_v49, %v1647_v9  ;;  %v1633_v46 = vadd.f32 %v1564_v6, %v1537_v0  ;;  %v1550_v9 = vmul.f32 %v3776_v15, %v3509_v13  ;;  %v2965_v13 = vld [vmem:[%s4056_s3] sm:$0xff]  }
 0x404   : > { %2775 = vmatprep.mubr.bf16.mxu0 %v2965_v13 }
 0x405   : > { %1721 = vrot.lane.b32.xlu1 %v1663_v57, %s3043_s25  ;;  %1688 = vrot.lane.b32.xlu0 %v1663_v57, %s3044_s26  ;;  %v1649_v62 = vmax.f32 %v1633_v46, 0.0 }
 0x406   : > { %v1569_v21 = vpop.permute.xlu1 %1568 }
 0x407   : > { %v1634_v22 = vadd.f32 %v1569_v21, %v1538_v11 }
 0x409   : > { %v1650_v10 = vmax.f32 %v1634_v22, 0.0  ;;  %1787 = vrot.lane.b32.xlu1 %v1663_v57, %s3045_s27  ;;  %1754 = vrot.lane.b32.xlu0 %v1663_v57, %s3046_s28 }
 0x40a   : > { %v1574_v16 = vpop.permute.xlu1 %1573  ;;  %v1579_v24 = vpop.permute.xlu0 %1578 }
 0x40b   : > { %v1664_v26 = vpack.c.bf16 %v1650_v10, %v1649_v62  ;;  %v1635_v54 = vadd.f32 %v1574_v16, %v1539_v50  ;;  %v1636_v58 = vadd.f32 %v1579_v24, %v1540_v36 }
 0x40d   : > { %1820 = vrot.lane.b32.xlu1 %v1663_v57, %s3047_s29  ;;  %1690 = vrot.lane.b32.xlu0 %v1664_v26, %s3044_s26  ;;  %v1651_v2 = vmax.f32 %v1635_v54, 0.0  ;;  %v1652_v14 = vmax.f32 %v1636_v58, 0.0 }
 0x40e   : > { %v1589_v1 = vpop.permute.xlu1 %1588  ;;  %v1584_v38 = vpop.permute.xlu0 %1583 }
 0x40f   : > { %v1665_v27 = vpack.c.bf16 %v1652_v14, %v1651_v2  ;;  %v1638_v20 = vadd.f32 %v1589_v1, %v1542_v59  ;;  %v1637_v51 = vadd.f32 %v1584_v38, %v1541_v19 }
 0x411   : > { %1853 = vrot.lane.b32.xlu1 %v1663_v57, %s3048_s30  ;;  %1723 = vrot.lane.b32.xlu0 %v1664_v26, %s3043_s25  ;;  %v1654_v41 = vmax.f32 %v1638_v20, 0.0  ;;  %v1653_v18 = vmax.f32 %v1637_v51, 0.0 }
 0x412   : > { %v1594_v3 = vpop.permute.xlu1 %1593  ;;  %v1599_v61 = vpop.permute.xlu0 %1598 }
 0x413   : > { %v1666_v28 = vpack.c.bf16 %v1654_v41, %v1653_v18  ;;  %v1639_v45 = vadd.f32 %v1594_v3, %v1543_v29  ;;  %v1640_v53 = vadd.f32 %v1599_v61, %v1544_v34 }
 0x415   : > { %1886 = vrot.lane.b32.xlu1 %v1663_v57, %s3049_s5  ;;  %1756 = vrot.lane.b32.xlu0 %v1664_v26, %s3046_s28  ;;  %v1655_v17 = vmax.f32 %v1639_v45, 0.0  ;;  %v1656_v35 = vmax.f32 %v1640_v53, 0.0 }
 0x416   : > { %v1609_v33 = vpop.permute.xlu1 %1608  ;;  %v1604_v7 = vpop.permute.xlu0 %1603 }
 0x417   : > { %v1667_v30 = vpack.c.bf16 %v1656_v35, %v1655_v17  ;;  %v1642_v37 = vadd.f32 %v1609_v33, %v1546_v32  ;;  %v1641_v48 = vadd.f32 %v1604_v7, %v1545_v52 }
 0x419   : > { %1789 = vrot.lane.b32.xlu0 %v1664_v26, %s3045_s27  ;;  %1692 = vrot.lane.b32.xlu1 %v1665_v27, %s3044_s26  ;;  %v1658_v63 = vmax.f32 %v1642_v37, 0.0  ;;  %v1657_v25 = vmax.f32 %v1641_v48, 0.0 }
 0x41a   : > { %v1614_v42 = vpop.permute.xlu1 %1613  ;;  %v1619_v8 = vpop.permute.xlu0 %1618 }
 0x41b   : > { %v1668_v39 = vpack.c.bf16 %v1658_v63, %v1657_v25  ;;  %v1643_v55 = vadd.f32 %v1614_v42, %v1547_v40  ;;  %v1644_v31 = vadd.f32 %v1619_v8, %v1548_v5 }
 0x41d   : > { %1822 = vrot.lane.b32.xlu0 %v1664_v26, %s3047_s29  ;;  %1725 = vrot.lane.b32.xlu1 %v1665_v27, %s3043_s25  ;;  %v1659_v60 = vmax.f32 %v1643_v55, 0.0  ;;  %v1660_v23 = vmax.f32 %v1644_v31, 0.0 }
 0x41e   : > { %v1629_v44 = vpop.permute.xlu1 %1628  ;;  %v1624_v12 = vpop.permute.xlu0 %1623 }
 0x41f   : > { %v1669_v43 = vpack.c.bf16 %v1660_v23, %v1659_v60  ;;  %v1646_v49 = vadd.f32 %v1629_v44, %v1550_v9  ;;  %v1645_v6 = vadd.f32 %v1624_v12, %v1549_v4 }
 0x421   : > { %1855 = vrot.lane.b32.xlu0 %v1664_v26, %s3048_s30  ;;  %1758 = vrot.lane.b32.xlu1 %v1665_v27, %s3046_s28  ;;  %v1662_v0 = vmax.f32 %v1646_v49, 0.0  ;;  %v1661_v57 = vmax.f32 %v1645_v6, 0.0 }
 0x423   : > { %v1670_v47 = vpack.c.bf16 %v1662_v0, %v1661_v57 }
 0x425   : > { %1888 = vrot.lane.b32.xlu0 %v1664_v26, %s3049_s5  ;;  %1791 = vrot.lane.b32.xlu1 %v1665_v27, %s3045_s27 }
 0x429   : > { %1824 = vrot.lane.b32.xlu1 %v1665_v27, %s3047_s29  ;;  %1694 = vrot.lane.b32.xlu0 %v1666_v28, %s3044_s26 }
 0x42d   : > { %1857 = vrot.lane.b32.xlu1 %v1665_v27, %s3048_s30  ;;  %1727 = vrot.lane.b32.xlu0 %v1666_v28, %s3043_s25 }
 0x431   : > { %1890 = vrot.lane.b32.xlu1 %v1665_v27, %s3049_s5  ;;  %1760 = vrot.lane.b32.xlu0 %v1666_v28, %s3046_s28 }
 0x435   : > { %1793 = vrot.lane.b32.xlu0 %v1666_v28, %s3045_s27  ;;  %1696 = vrot.lane.b32.xlu1 %v1667_v30, %s3044_s26 }
 0x439   : > { %1826 = vrot.lane.b32.xlu0 %v1666_v28, %s3047_s29  ;;  %1729 = vrot.lane.b32.xlu1 %v1667_v30, %s3043_s25 }
 0x43d   : > { %1859 = vrot.lane.b32.xlu0 %v1666_v28, %s3048_s30  ;;  %1762 = vrot.lane.b32.xlu1 %v1667_v30, %s3046_s28 }
 0x441   : > { %1892 = vrot.lane.b32.xlu0 %v1666_v28, %s3049_s5  ;;  %1795 = vrot.lane.b32.xlu1 %v1667_v30, %s3045_s27 }
 0x445   : > { %1828 = vrot.lane.b32.xlu1 %v1667_v30, %s3047_s29  ;;  %1698 = vrot.lane.b32.xlu0 %v1668_v39, %s3044_s26 }
 0x449   : > { %1861 = vrot.lane.b32.xlu1 %v1667_v30, %s3048_s30  ;;  %1731 = vrot.lane.b32.xlu0 %v1668_v39, %s3043_s25 }
 0x44d   : > { %1894 = vrot.lane.b32.xlu1 %v1667_v30, %s3049_s5  ;;  %1764 = vrot.lane.b32.xlu0 %v1668_v39, %s3046_s28 }
 0x451   : > { %1797 = vrot.lane.b32.xlu0 %v1668_v39, %s3045_s27  ;;  %1700 = vrot.lane.b32.xlu1 %v1669_v43, %s3044_s26 }
 0x455   : > { %1830 = vrot.lane.b32.xlu0 %v1668_v39, %s3047_s29  ;;  %1733 = vrot.lane.b32.xlu1 %v1669_v43, %s3043_s25 }
 0x459   : > { %1863 = vrot.lane.b32.xlu0 %v1668_v39, %s3048_s30  ;;  %1766 = vrot.lane.b32.xlu1 %v1669_v43, %s3046_s28 }
 0x45d   : > { %1896 = vrot.lane.b32.xlu0 %v1668_v39, %s3049_s5  ;;  %1799 = vrot.lane.b32.xlu1 %v1669_v43, %s3045_s27 }
 0x461   : > { %1832 = vrot.lane.b32.xlu1 %v1669_v43, %s3047_s29  ;;  %1702 = vrot.lane.b32.xlu0 %v1670_v47, %s3044_s26  ;;  %s3054_s26 = smov 109  }
 0x465   : > { %1865 = vrot.lane.b32.xlu1 %v1669_v43, %s3048_s30  ;;  %1735 = vrot.lane.b32.xlu0 %v1670_v47, %s3043_s25  ;;  %s3053_s25 = smov 126  }
 0x469   : > { %1898 = vrot.lane.b32.xlu1 %v1669_v43, %s3049_s5  ;;  %1768 = vrot.lane.b32.xlu0 %v1670_v47, %s3046_s28  ;;  %s3056_s28 = smov 118  }
 0x46d   : > { %1834 = vrot.lane.b32.xlu1 %v1670_v47, %s3047_s29  ;;  %1801 = vrot.lane.b32.xlu0 %v1670_v47, %s3045_s27  ;;  %s3055_s27 = smov 119   ;;  %s3057_s29 = smov 108  }
 0x471   : > { %1900 = vrot.lane.b32.xlu1 %v1670_v47, %s3049_s5  ;;  %1867 = vrot.lane.b32.xlu0 %v1670_v47, %s3048_s30 }
 0x477   : > { %v1722_v15 = vpop.permute.xlu1 %1721  ;;  %v1689_v11 = vpop.permute.xlu0 %1688 }
 0x478   : > { %1713 = vst.msk [vmem:[#allocation3] sm:$0xff] %vm1712_vm3, %v1689_v11  ;;  %v2968_v11 = vld [vmem:[%s4056_s3 + $0x58] sm:$0xff]  }
 0x479   : > { %1746 = vst.msk [vmem:[#allocation3] sm:$0xff] %vm1745_vm4, %v1722_v15  ;;  %v2967_v15 = vld [vmem:[%s4056_s3 + $0x8] sm:$0xff]  }
 0x47b   : > { %v1788_v46 = vpop.permute.xlu1 %1787  ;;  %v1755_v21 = vpop.permute.xlu0 %1754 }
 0x47c   : > { %1779 = vst.msk [vmem:[#allocation3] sm:$0xff] %vm1778_vm5, %v1755_v21  ;;  %v2971_v21 = vld [vmem:[%s4056_s3 + $0x60] sm:$0xff]  }
 0x47d   : > { %1812 = vst.msk [vmem:[#allocation3] sm:$0xff] %vm1811_vm6, %v1788_v46  ;;  %v2969_v46 = vld [vmem:[%s4056_s3 + $0x10] sm:$0xff]  }
 0x47f   : > { %v1821_v22 = vpop.permute.xlu1 %1820  ;;  %v1691_v62 = vpop.permute.xlu0 %1690 }
 0x480   : > { %1845 = vst.msk [vmem:[#allocation3] sm:$0xff] %vm1844_vm7, %v1821_v22  ;;  %v2970_v22 = vld [vmem:[%s4056_s3 + $0x18] sm:$0xff]  }
 0x481   : > { %1714 = vst.msk [vmem:[#allocation3 + $0x8] sm:$0xff] %vm1712_vm3, %v1691_v62  ;;  %v2972_v62 = vld [vmem:[%s4056_s3 + $0x68] sm:$0xff]  }
 0x483   : > { %v1854_v10 = vpop.permute.xlu1 %1853  ;;  %v1724_v26 = vpop.permute.xlu0 %1723 }
 0x484   : > { %1878 = vst.msk [vmem:[#allocation3] sm:$0xff] %vm1877_vm8, %v1854_v10  ;;  %v2973_v10 = vld [vmem:[%s4056_s3 + $0x20] sm:$0xff]  }
 0x485   : > { %1747 = vst.msk [vmem:[#allocation3 + $0x8] sm:$0xff] %vm1745_vm4, %v1724_v26  ;;  %v2975_v26 = vld [vmem:[%s4056_s3 + $0x70] sm:$0xff]  }
 0x487   : > { %v1887_v16 = vpop.permute.xlu1 %1886  ;;  %v1757_v24 = vpop.permute.xlu0 %1756 }
 0x488   : > { %1911 = vst.msk [vmem:[#allocation3] sm:$0xff] %vm1910_vm9, %v1887_v16  ;;  %v2974_v16 = vld [vmem:[%s4056_s3 + $0x28] sm:$0xff]  }
 0x489   : > { %1780 = vst.msk [vmem:[#allocation3 + $0x8] sm:$0xff] %vm1778_vm5, %v1757_v24  ;;  %v2976_v24 = vld [vmem:[%s4056_s3 + $0x78] sm:$0xff]  }
 0x48b   : > { %v1693_v36 = vpop.permute.xlu1 %1692  ;;  %v1790_v50 = vpop.permute.xlu0 %1789 }
 0x48c   : > { %1715 = vst.msk [vmem:[#allocation3 + $0x10] sm:$0xff] %vm1712_vm3, %v1693_v36  ;;  %v2977_v36 = vld [vmem:[%s4056_s3 + $0x30] sm:$0xff]  }
 0x48d   : > { %1813 = vst.msk [vmem:[#allocation3 + $0x8] sm:$0xff] %vm1811_vm6, %v1790_v50  ;;  %v2981_v50 = vld [vmem:[%s4056_s3 + $0x80] sm:$0xff]  }
 0x48f   : > { %v1726_v54 = vpop.permute.xlu1 %1725  ;;  %v1823_v58 = vpop.permute.xlu0 %1822  ;;  %v1955_v2 = vld [vmem:[#allocation3] sm:$0xff] }
 0x490   : > { %1748 = vst.msk [vmem:[#allocation3 + $0x10] sm:$0xff] %vm1745_vm4, %v1726_v54  ;;  %2759 = vmatprep.subr.bf16.mxu0 %v1955_v2  ;;  %2827 = vmatprep.subr.bf16.mxu1 %v1955_v2  ;;  %v2978_v54 = vld [vmem:[%s4056_s3 + $0x38] sm:$0xff]  }
 0x491   : > { %1846 = vst.msk [vmem:[#allocation3 + $0x8] sm:$0xff] %vm1844_vm7, %v1823_v58  ;;  %2760 = vmatpush3.bf16.msra.mxu0 %v1955_v2  ;;  %2835 = vmatpush3.bf16.msra.mxu1 %v1955_v2  ;;  %v2982_v58 = vld [vmem:[%s4056_s3 + $0x88] sm:$0xff]   ;;  %v2979_v2 = vld [vmem:[%s4056_s3 + $0x40] sm:$0xff]  }
 0x493   : > { %v1759_v14 = vpop.permute.xlu1 %1758  ;;  %v1856_v27 = vpop.permute.xlu0 %1855 }
 0x494   : > { %1781 = vst.msk [vmem:[#allocation3 + $0x10] sm:$0xff] %vm1778_vm5, %v1759_v14  ;;  %v2980_v14 = vld [vmem:[%s4056_s3 + $0x48] sm:$0xff]  }
 0x495   : > { %1879 = vst.msk [vmem:[#allocation3 + $0x8] sm:$0xff] %vm1877_vm8, %v1856_v27 }
 0x497   : > { %v1792_v1 = vpop.permute.xlu1 %1791  ;;  %v1889_v38 = vpop.permute.xlu0 %1888 }
 0x498   : > { %1814 = vst.msk [vmem:[#allocation3 + $0x10] sm:$0xff] %vm1811_vm6, %v1792_v1 }
 0x499   : > { %1912 = vst.msk [vmem:[#allocation3 + $0x8] sm:$0xff] %vm1910_vm9, %v1889_v38 }
 0x49b   : > { %v1825_v19 = vpop.permute.xlu1 %1824  ;;  %v1695_v59 = vpop.permute.xlu0 %1694 }
 0x49c   : > { %1847 = vst.msk [vmem:[#allocation3 + $0x10] sm:$0xff] %vm1844_vm7, %v1825_v19 }
 0x49d   : > { %1716 = vst.msk [vmem:[#allocation3 + $0x18] sm:$0xff] %vm1712_vm3, %v1695_v59 }
 0x49f   : > { %v1858_v20 = vpop.permute.xlu1 %1857  ;;  %v1728_v51 = vpop.permute.xlu0 %1727 }
 0x4a0   : > { %v1956_v41 = vld [vmem:[#allocation3 + $0x8] sm:$0xff]  ;;  %1880 = vst.msk [vmem:[#allocation3 + $0x10] sm:$0xff] %vm1877_vm8, %v1858_v20 }
 0x4a1   : > { %1749 = vst.msk [vmem:[#allocation3 + $0x18] sm:$0xff] %vm1745_vm4, %v1728_v51  ;;  %2761 = vmatprep.subr.bf16.mxu0 %v1956_v41  ;;  %2828 = vmatprep.subr.bf16.mxu1 %v1956_v41 }
 0x4a2   : > { %2762 = vmatpush3.bf16.msra.mxu0 %v1956_v41  ;;  %2836 = vmatpush3.bf16.msra.mxu1 %v1956_v41 }
 0x4a3   : > { %v1891_v18 = vpop.permute.xlu1 %1890  ;;  %v1761_v28 = vpop.permute.xlu0 %1760 }
 0x4a4   : > { %1913 = vst.msk [vmem:[#allocation3 + $0x10] sm:$0xff] %vm1910_vm9, %v1891_v18 }
 0x4a5   : > { %1782 = vst.msk [vmem:[#allocation3 + $0x18] sm:$0xff] %vm1778_vm5, %v1761_v28 }
 0x4a7   : > { %v1697_v3 = vpop.permute.xlu1 %1696  ;;  %v1794_v61 = vpop.permute.xlu0 %1793 }
 0x4a8   : > { %1717 = vst.msk [vmem:[#allocation3 + $0x20] sm:$0xff] %vm1712_vm3, %v1697_v3 }
 0x4a9   : > { %1815 = vst.msk [vmem:[#allocation3 + $0x18] sm:$0xff] %vm1811_vm6, %v1794_v61 }
 0x4ab   : > { %v1730_v29 = vpop.permute.xlu1 %1729  ;;  %v1827_v34 = vpop.permute.xlu0 %1826  ;;  %v1957_v45 = vld [vmem:[#allocation3 + $0x10] sm:$0xff] }
 0x4ac   : > { %1750 = vst.msk [vmem:[#allocation3 + $0x20] sm:$0xff] %vm1745_vm4, %v1730_v29  ;;  %2763 = vmatprep.subr.bf16.mxu0 %v1957_v45  ;;  %2829 = vmatprep.subr.bf16.mxu1 %v1957_v45 }
 0x4ad   : > { %1848 = vst.msk [vmem:[#allocation3 + $0x18] sm:$0xff] %vm1844_vm7, %v1827_v34  ;;  %2764 = vmatpush3.bf16.msra.mxu0 %v1957_v45  ;;  %2837 = vmatpush3.bf16.msra.mxu1 %v1957_v45 }
 0x4af   : > { %v1763_v53 = vpop.permute.xlu1 %1762  ;;  %v1860_v17 = vpop.permute.xlu0 %1859 }
 0x4b0   : > { %1783 = vst.msk [vmem:[#allocation3 + $0x20] sm:$0xff] %vm1778_vm5, %v1763_v53 }
 0x4b1   : > { %1881 = vst.msk [vmem:[#allocation3 + $0x18] sm:$0xff] %vm1877_vm8, %v1860_v17 }
 0x4b3   : > { %v1796_v35 = vpop.permute.xlu1 %1795  ;;  %v1893_v30 = vpop.permute.xlu0 %1892 }
 0x4b4   : > { %1816 = vst.msk [vmem:[#allocation3 + $0x20] sm:$0xff] %vm1811_vm6, %v1796_v35 }
 0x4b5   : > { %1914 = vst.msk [vmem:[#allocation3 + $0x18] sm:$0xff] %vm1910_vm9, %v1893_v30 }
 0x4b7   : > { %v1829_v33 = vpop.permute.xlu1 %1828  ;;  %v1699_v7 = vpop.permute.xlu0 %1698 }
 0x4b8   : > { %1849 = vst.msk [vmem:[#allocation3 + $0x20] sm:$0xff] %vm1844_vm7, %v1829_v33 }
 0x4b9   : > { %1718 = vst.msk [vmem:[#allocation3 + $0x28] sm:$0xff] %vm1712_vm3, %v1699_v7 }
 0x4bb   : > { %v1862_v52 = vpop.permute.xlu1 %1861  ;;  %v1732_v32 = vpop.permute.xlu0 %1731 }
 0x4bc   : > { %v1958_v37 = vld [vmem:[#allocation3 + $0x18] sm:$0xff]  ;;  %1882 = vst.msk [vmem:[#allocation3 + $0x20] sm:$0xff] %vm1877_vm8, %v1862_v52 }
 0x4bd   : > { %1751 = vst.msk [vmem:[#allocation3 + $0x28] sm:$0xff] %vm1745_vm4, %v1732_v32  ;;  %2765 = vmatprep.subr.bf16.mxu0 %v1958_v37  ;;  %2830 = vmatprep.subr.bf16.mxu1 %v1958_v37 }
 0x4be   : > { %2766 = vmatpush3.bf16.msra.mxu0 %v1958_v37  ;;  %2838 = vmatpush3.bf16.msra.mxu1 %v1958_v37 }
 0x4bf   : > { %v1895_v48 = vpop.permute.xlu1 %1894  ;;  %v1765_v63 = vpop.permute.xlu0 %1764 }
 0x4c0   : > { %1915 = vst.msk [vmem:[#allocation3 + $0x20] sm:$0xff] %vm1910_vm9, %v1895_v48 }
 0x4c1   : > { %1784 = vst.msk [vmem:[#allocation3 + $0x28] sm:$0xff] %vm1778_vm5, %v1765_v63 }
 0x4c3   : > { %v1701_v25 = vpop.permute.xlu1 %1700  ;;  %v1798_v39 = vpop.permute.xlu0 %1797 }
 0x4c4   : > { %1719 = vst.msk [vmem:[#allocation3 + $0x30] sm:$0xff] %vm1712_vm3, %v1701_v25 }
 0x4c5   : > { %1817 = vst.msk [vmem:[#allocation3 + $0x28] sm:$0xff] %vm1811_vm6, %v1798_v39 }
 0x4c7   : > { %v1734_v42 = vpop.permute.xlu1 %1733  ;;  %v1831_v8 = vpop.permute.xlu0 %1830  ;;  %v1959_v40 = vld [vmem:[#allocation3 + $0x20] sm:$0xff] }
 0x4c8   : > { %1752 = vst.msk [vmem:[#allocation3 + $0x30] sm:$0xff] %vm1745_vm4, %v1734_v42  ;;  %2767 = vmatprep.subr.bf16.mxu0 %v1959_v40  ;;  %2831 = vmatprep.subr.bf16.mxu1 %v1959_v40 }
 0x4c9   : > { %1850 = vst.msk [vmem:[#allocation3 + $0x28] sm:$0xff] %vm1844_vm7, %v1831_v8  ;;  %2768 = vmatpush3.bf16.msra.mxu0 %v1959_v40  ;;  %2839 = vmatpush3.bf16.msra.mxu1 %v1959_v40 }
 0x4cb   : > { %v1767_v5 = vpop.permute.xlu1 %1766  ;;  %v1864_v55 = vpop.permute.xlu0 %1863 }
 0x4cc   : > { %1785 = vst.msk [vmem:[#allocation3 + $0x30] sm:$0xff] %vm1778_vm5, %v1767_v5 }
 0x4cd   : > { %1883 = vst.msk [vmem:[#allocation3 + $0x28] sm:$0xff] %vm1877_vm8, %v1864_v55 }
 0x4cf   : > { %v1800_v31 = vpop.permute.xlu1 %1799  ;;  %v1897_v60 = vpop.permute.xlu0 %1896 }
 0x4d0   : > { %1818 = vst.msk [vmem:[#allocation3 + $0x30] sm:$0xff] %vm1811_vm6, %v1800_v31 }
 0x4d1   : > { %1916 = vst.msk [vmem:[#allocation3 + $0x28] sm:$0xff] %vm1910_vm9, %v1897_v60 }
 0x4d3   : > { %v1833_v23 = vpop.permute.xlu1 %1832  ;;  %v1703_v43 = vpop.permute.xlu0 %1702 }
 0x4d4   : > { %1851 = vst.msk [vmem:[#allocation3 + $0x30] sm:$0xff] %vm1844_vm7, %v1833_v23 }
 0x4d5   : > { %1720 = vst.msk [vmem:[#allocation3 + $0x38] sm:$0xff] %vm1712_vm3, %v1703_v43 }
 0x4d7   : > { %v1866_v44 = vpop.permute.xlu1 %1865  ;;  %v1736_v12 = vpop.permute.xlu0 %1735 }
 0x4d8   : > { %v1960_v4 = vld [vmem:[#allocation3 + $0x28] sm:$0xff]  ;;  %1884 = vst.msk [vmem:[#allocation3 + $0x30] sm:$0xff] %vm1877_vm8, %v1866_v44 }
 0x4d9   : > { %1753 = vst.msk [vmem:[#allocation3 + $0x38] sm:$0xff] %vm1745_vm4, %v1736_v12  ;;  %2769 = vmatprep.subr.bf16.mxu0 %v1960_v4  ;;  %2832 = vmatprep.subr.bf16.mxu1 %v1960_v4 }
 0x4da   : > { %2770 = vmatpush3.bf16.msra.mxu0 %v1960_v4  ;;  %2840 = vmatpush3.bf16.msra.mxu1 %v1960_v4 }
 0x4db   : > { %v1899_v9 = vpop.permute.xlu1 %1898  ;;  %v1769_v49 = vpop.permute.xlu0 %1768 }
 0x4dc   : > { %1917 = vst.msk [vmem:[#allocation3 + $0x30] sm:$0xff] %vm1910_vm9, %v1899_v9 }
 0x4dd   : > { %1786 = vst.msk [vmem:[#allocation3 + $0x38] sm:$0xff] %vm1778_vm5, %v1769_v49 }
 0x4df   : > { %v1835_v6 = vpop.permute.xlu1 %1834  ;;  %v1802_v0 = vpop.permute.xlu0 %1801 }
 0x4e0   : > { %1819 = vst.msk [vmem:[#allocation3 + $0x38] sm:$0xff] %vm1811_vm6, %v1802_v0 }
 0x4e1   : > { %1852 = vst.msk [vmem:[#allocation3 + $0x38] sm:$0xff] %vm1844_vm7, %v1835_v6 }
 0x4e3   : > { %v1901_v57 = vpop.permute.xlu1 %1900  ;;  %v1868_v47 = vpop.permute.xlu0 %1867  ;;  %v1961_v13 = vld [vmem:[#allocation3 + $0x30] sm:$0xff] }
 0x4e4   : > { %1885 = vst.msk [vmem:[#allocation3 + $0x38] sm:$0xff] %vm1877_vm8, %v1868_v47  ;;  %2771 = vmatprep.subr.bf16.mxu0 %v1961_v13  ;;  %2833 = vmatprep.subr.bf16.mxu1 %v1961_v13 }
 0x4e5   : > { %1918 = vst.msk [vmem:[#allocation3 + $0x38] sm:$0xff] %vm1910_vm9, %v1901_v57  ;;  %2772 = vmatpush3.bf16.msra.mxu0 %v1961_v13  ;;  %2841 = vmatpush3.bf16.msra.mxu1 %v1961_v13 }
 0x4ec   : > { %v1962_v56 = vld [vmem:[#allocation3 + $0x38] sm:$0xff] }
 0x4ed   : > { %2773 = vmatprep.subr.bf16.mxu0 %v1962_v56  ;;  %2834 = vmatprep.subr.bf16.mxu1 %v1962_v56 }
 0x4ee   : > { %2774 = vmatpush3.bf16.msra.mxu0 %v1962_v56  ;;  %2842 = vmatpush3.bf16.msra.mxu1 %v1962_v56 }
 0x4f1   : > { %2776 = vmatmul.mubr.bf16.vlgmr.msra.gmra.mrb[0].mxu0 %v2967_v15  ;;  %2796 = vmatmul.mubr.bf16.vlgmr.msra.gmra.mrb[0].mxu1 %v2968_v11 }
 0x4f2   : > { %2779 = vmatprep.mubr.bf16.mxu0 %v2969_v46  ;;  %2799 = vmatprep.mubr.bf16.mxu1 %v2971_v21 }
 0x4f9   : > { %2780 = vmatmul.mubr.bf16.gmra.mrb[4].mxu0 %v2970_v22  ;;  %2800 = vmatmul.mubr.bf16.gmra.mrb[4].mxu1 %v2972_v62 }
 0x4fa   : > { %2783 = vmatprep.mubr.bf16.mxu0 %v2973_v10  ;;  %2803 = vmatprep.mubr.bf16.mxu1 %v2975_v26 }
 0x501   : > { %2784 = vmatmul.mubr.bf16.gmra.mrb[8].mxu0 %v2974_v16  ;;  %2804 = vmatmul.mubr.bf16.gmra.mrb[8].mxu1 %v2976_v24 }
 0x502   : > { %2787 = vmatprep.mubr.bf16.mxu0 %v2977_v36  ;;  %2807 = vmatprep.mubr.bf16.mxu1 %v2981_v50 }
 0x509   : > { %2788 = vmatmul.mubr.bf16.gmra.mrb[12].mxu0 %v2978_v54  ;;  %2808 = vmatmul.mubr.bf16.gmra.mrb[12].mxu1 %v2982_v58 }
 0x50a   : > { %2791 = vmatprep.mubr.bf16.mxu0 %v2979_v2 }
 0x511   : > { %2792 = vmatmul.mubr.bf16.gmra.mrb[16].mxu0 %v2980_v14 }
 0x5c4   : > { %v3999_v27 = vpop.f32.mrb[0].mxu0  ;;  %v2797_v1 = vpop.f32.mrb[0].mxu1 }
 0x5c5   : > { %2336 = vrot.lane.b32.xlu0 %v2797_v1, %s3050_s21  ;;  %v4001_v38 = vpop.f32.mrb[1].mxu0  ;;  %v2185_v19 = vpop.f32.mrb[1].mxu1 }
 0x5c6   : > { %v4003_v59 = vpop.f32.mrb[2].mxu0  ;;  %v2798_v20 = vpop.f32.mrb[2].mxu1 }
 0x5c7   : > { %2338 = vrot.lane.b32.xlu1 %v2798_v20, %s3050_s21  ;;  %v4005_v51 = vpop.f32.mrb[3].mxu0  ;;  %v2188_v41 = vpop.f32.mrb[3].mxu1 }
 0x5c9   : > { %2332 = vrot.lane.b32.xlu0 %v2185_v19, %s3050_s21 }
 0x5cb   : > { %2334 = vrot.lane.b32.xlu1 %v2188_v41, %s3050_s21 }
 0x5cc   : > { %v2781_v18 = vpop.f32.mrb[4].mxu0  ;;  %v2801_v28 = vpop.f32.mrb[4].mxu1 }
 0x5cd   : > { %2256 = vrot.lane.b32.xlu0 %v2781_v18, %s3051_s23  ;;  %v2121_v3 = vpop.f32.mrb[5].mxu0  ;;  %v2201_v61 = vpop.f32.mrb[5].mxu1 }
 0x5ce   : > { %v2782_v29 = vpop.f32.mrb[6].mxu0  ;;  %v2802_v34 = vpop.f32.mrb[6].mxu1 }
 0x5cf   : > { %2258 = vrot.lane.b32.xlu1 %v2782_v29, %s3051_s23  ;;  %v2124_v45 = vpop.f32.mrb[7].mxu0  ;;  %v2204_v53 = vpop.f32.mrb[7].mxu1 }
 0x5d1   : > { %2356 = vrot.lane.b32.xlu0 %v2801_v28, %s3052_s24 }
 0x5d3   : > { %2358 = vrot.lane.b32.xlu1 %v2802_v34, %s3052_s24 }
 0x5d4   : > { %v2785_v17 = vpop.f32.mrb[8].mxu0  ;;  %v2805_v35 = vpop.f32.mrb[8].mxu1 }
 0x5d5   : > { %2252 = vrot.lane.b32.xlu0 %v2121_v3, %s3051_s23  ;;  %v2137_v30 = vpop.f32.mrb[9].mxu0  ;;  %v2217_v33 = vpop.f32.mrb[9].mxu1 }
 0x5d6   : > { %v2786_v7 = vpop.f32.mrb[10].mxu0  ;;  %v2806_v52 = vpop.f32.mrb[10].mxu1 }
 0x5d7   : > { %2254 = vrot.lane.b32.xlu1 %v2124_v45, %s3051_s23  ;;  %v2140_v32 = vpop.f32.mrb[11].mxu0  ;;  %v2220_v37 = vpop.f32.mrb[11].mxu1 }
 0x5d9   : > { %2352 = vrot.lane.b32.xlu0 %v2201_v61, %s3052_s24 }
 0x5db   : > { %2354 = vrot.lane.b32.xlu1 %v2204_v53, %s3052_s24 }
 0x5dc   : > { %v2789_v48 = vpop.f32.mrb[12].mxu0  ;;  %v2809_v63 = vpop.f32.mrb[12].mxu1 }
 0x5dd   : > { %2276 = vrot.lane.b32.xlu0 %v2785_v17, %s3053_s25  ;;  %v2153_v25 = vpop.f32.mrb[13].mxu0  ;;  %v2233_v39 = vpop.f32.mrb[13].mxu1 }
 0x5de   : > { %v2790_v42 = vpop.f32.mrb[14].mxu0  ;;  %v2810_v8 = vpop.f32.mrb[14].mxu1 }
 0x5df   : > { %2278 = vrot.lane.b32.xlu1 %v2786_v7, %s3053_s25  ;;  %v2156_v40 = vpop.f32.mrb[15].mxu0  ;;  %v2236_v5 = vpop.f32.mrb[15].mxu1 }
 0x5e1   : > { %2376 = vrot.lane.b32.xlu0 %v2805_v35, %s3054_s26 }
 0x5e3   : > { %2378 = vrot.lane.b32.xlu1 %v2806_v52, %s3054_s26 }
 0x5e4   : > { %v2793_v55 = vpop.f32.mrb[16].mxu0 }
 0x5e5   : > { %2272 = vrot.lane.b32.xlu0 %v2137_v30, %s3053_s25  ;;  %v2169_v31 = vpop.f32.mrb[17].mxu0 }
 0x5e6   : > { %v2794_v60 = vpop.f32.mrb[18].mxu0 }
 0x5e7   : > { %2274 = vrot.lane.b32.xlu1 %v2140_v32, %s3053_s25  ;;  %v2172_v23 = vpop.f32.mrb[19].mxu0 }
 0x5e9   : > { %2372 = vrot.lane.b32.xlu0 %v2217_v33, %s3054_s26 }
 0x5eb   : > { %2374 = vrot.lane.b32.xlu1 %v2220_v37, %s3054_s26 }
 0x5ed   : > { %2296 = vrot.lane.b32.xlu0 %v2789_v48, %s3055_s27 }
 0x5ef   : > { %2298 = vrot.lane.b32.xlu1 %v2790_v42, %s3055_s27 }
 0x5f1   : > { %2292 = vrot.lane.b32.xlu0 %v2153_v25, %s3055_s27 }
 0x5f3   : > { %2294 = vrot.lane.b32.xlu1 %v2156_v40, %s3055_s27 }
 0x5f5   : > { %2316 = vrot.lane.b32.xlu0 %v2793_v55, %s3056_s28 }
 0x5f7   : > { %2318 = vrot.lane.b32.xlu1 %v2794_v60, %s3056_s28 }
 0x5f9   : > { %2312 = vrot.lane.b32.xlu0 %v2169_v31, %s3056_s28 }
 0x5fb   : > { %2314 = vrot.lane.b32.xlu1 %v2172_v23, %s3056_s28 }
 0x5fd   : > { %2392 = vrot.lane.b32.xlu0 %v2233_v39, %s3057_s29 }
 0x5ff   : > { %2394 = vrot.lane.b32.xlu1 %v2236_v5, %s3057_s29 }
 0x601   : > { %2396 = vrot.lane.b32.xlu0 %v2809_v63, %s3057_s29 }
 0x603   : > { %2398 = vrot.lane.b32.xlu1 %v2810_v8, %s3057_s29 }
 0x637   : > { %v2337_v43 = vpop.permute.xlu0 %2336 }
 0x639   : > { %v2339_v44 = vpop.permute.xlu1 %2338 }
 0x63b   : > { %v2333_v12 = vpop.permute.xlu0 %2332 }
 0x63d   : > { %v2335_v4 = vpop.permute.xlu1 %2334 }
 0x63f   : > { %v2257_v9 = vpop.permute.xlu0 %2256 }
 0x640   : > { %v2266_v36 = vadd.f32 %v3999_v27, %v2257_v9 }
 0x641   : > { %v2259_v49 = vpop.permute.xlu1 %2258 }
 0x642   : > { %v2267_v54 = vadd.f32 %v4003_v59, %v2259_v49 }
 0x643   : > { %v2357_v6 = vpop.permute.xlu0 %2356 }
 0x645   : > { %v2359_v0 = vpop.permute.xlu1 %2358 }
 0x647   : > { %v2253_v57 = vpop.permute.xlu0 %2252 }
 0x648   : > { %v2264_v14 = vadd.f32 %v2253_v57, %v4001_v38 }
 0x649   : > { %v2255_v47 = vpop.permute.xlu1 %2254 }
 0x64a   : > { %v2265_v41 = vadd.f32 %v2255_v47, %v4005_v51 }
 0x64b   : > { %v2353_v13 = vpop.permute.xlu0 %2352 }
 0x64d   : > { %v2355_v56 = vpop.permute.xlu1 %2354 }
 0x64f   : > { %v2277_v15 = vpop.permute.xlu0 %2276 }
 0x650   : > { %v2286_v58 = vadd.f32 %v2277_v15, %v2266_v36 }
 0x651   : > { %v2279_v11 = vpop.permute.xlu1 %2278 }
 0x652   : > { %v2287_v1 = vadd.f32 %v2279_v11, %v2267_v54 }
 0x653   : > { %v2377_v46 = vpop.permute.xlu0 %2376 }
 0x655   : > { %v2379_v21 = vpop.permute.xlu1 %2378 }
 0x657   : > { %v2273_v22 = vpop.permute.xlu0 %2272 }
 0x658   : > { %v2284_v18 = vadd.f32 %v2273_v22, %v2264_v14 }
 0x659   : > { %v2275_v62 = vpop.permute.xlu1 %2274 }
 0x65a   : > { %v2285_v29 = vadd.f32 %v2275_v62, %v2265_v41 }
 0x65b   : > { %v2373_v10 = vpop.permute.xlu0 %2372 }
 0x65d   : > { %v2375_v26 = vpop.permute.xlu1 %2374 }
 0x65f   : > { %v2297_v16 = vpop.permute.xlu0 %2296 }
 0x660   : > { %v2306_v19 = vadd.f32 %v2297_v16, %v2286_v58 }
 0x661   : > { %v2299_v24 = vpop.permute.xlu1 %2298 }
 0x662   : > { %v2307_v28 = vadd.f32 %v2299_v24, %v2287_v1 }
 0x663   : > { %v2293_v50 = vpop.permute.xlu0 %2292 }
 0x664   : > { %v2304_v34 = vadd.f32 %v2293_v50, %v2284_v18 }
 0x665   : > { %v2295_v2 = vpop.permute.xlu1 %2294 }
 0x666   : > { %v2305_v17 = vadd.f32 %v2295_v2, %v2285_v29 }
 0x667   : > { %v2317_v20 = vpop.permute.xlu0 %2316 }
 0x668   : > { %v2326_v3 = vadd.f32 %v2317_v20, %v2306_v19 }
 0x669   : > { %v2319_v61 = vpop.permute.xlu1 %2318 }
 0x66a   : > { %v2346_v45 = vadd.f32 %v2337_v43, %v2326_v3  ;;  %v2327_v27 = vadd.f32 %v2319_v61, %v2307_v28  ;;  %v3058_v43 = vmov 0.0  }
 0x66b   : > { %v2313_v53 = vpop.permute.xlu0 %2312 }
 0x66c   : > { %v2347_v59 = vadd.f32 %v2339_v44, %v2327_v27  ;;  %v2324_v35 = vadd.f32 %v2313_v53, %v2304_v34  ;;  %v2366_v7 = vadd.f32 %v2357_v6, %v2346_v45 }
 0x66d   : > { %v2315_v30 = vpop.permute.xlu1 %2314 }
 0x66e   : > { %v2344_v33 = vadd.f32 %v2333_v12, %v2324_v35  ;;  %v2325_v38 = vadd.f32 %v2315_v30, %v2305_v17  ;;  %v2367_v51 = vadd.f32 %v2359_v0, %v2347_v59  ;;  %v2386_v39 = vadd.f32 %v2377_v46, %v2366_v7 }
 0x66f   : > { %v2393_v52 = vpop.permute.xlu0 %2392 }
 0x670   : > { %v2345_v32 = vadd.f32 %v2335_v4, %v2325_v38  ;;  %v2364_v37 = vadd.f32 %v2353_v13, %v2344_v33  ;;  %v2387_v55 = vadd.f32 %v2379_v21, %v2367_v51 }
 0x671   : > { %v2395_v48 = vpop.permute.xlu1 %2394 }
 0x672   : > { %v2384_v63 = vadd.f32 %v2373_v10, %v2364_v37  ;;  %v2365_v25 = vadd.f32 %v2355_v56, %v2345_v32 }
 0x673   : > { %v2397_v42 = vpop.permute.xlu0 %2396 }
 0x674   : > { %v2404_v8 = vadd.f32 %v2393_v52, %v2384_v63  ;;  %v2385_v40 = vadd.f32 %v2375_v26, %v2365_v25  ;;  %v2406_v5 = vadd.f32 %v2397_v42, %v2386_v39 }
 0x675   : > { %v2399_v31 = vpop.permute.xlu1 %2398 }
 0x676   : > { %2409 = vst.msk [vmem:[%s4057_s4] sm:$0xff] %vm2408_vm10, %v2404_v8  ;;  %v2405_v60 = vadd.f32 %v2395_v48, %v2385_v40  ;;  %2411 = vst.msk [vmem:[%s4057_s4 + $0x10] sm:$0xff] %vm2408_vm10, %v2406_v5  ;;  %v2407_v23 = vadd.f32 %v2399_v31, %v2387_v55 }
 0x677   : > { %2414 = vst.msk [vmem:[%s4057_s4] sm:$0xff] %vm2413_vm11, %v3058_v43  ;;  %2416 = vst.msk [vmem:[%s4057_s4 + $0x10] sm:$0xff] %vm2413_vm11, %v3058_v43 }
 0x678   : > { %2410 = vst.msk [vmem:[%s4057_s4 + $0x8] sm:$0xff] %vm2408_vm10, %v2405_v60  ;;  %2412 = vst.msk [vmem:[%s4057_s4 + $0x18] sm:$0xff] %vm2408_vm10, %v2407_v23 }
 0x679   : > { %2415 = vst.msk [vmem:[%s4057_s4 + $0x8] sm:$0xff] %vm2413_vm11, %v3058_v43  ;;  %2417 = vst.msk [vmem:[%s4057_s4 + $0x18] sm:$0xff] %vm2413_vm11, %v3058_v43 }
 0x67a PF: > { %p11_p11 = scmp.ge.s32.totalorder %s3103_s19, 4   ;;  %s4061_s15 = smov %s3033_s16 }
 0x67b   : > { %s4062_s16 = smov %s3112_s22  ;;  %s4063_s17 = smov %s3103_s19 }
 0x67c   :  { %13 = sbr.rel (!%p11_p11) target bundleno = 2 (0x2), region = 101 }

</bundles_post_ra>
